<compile_context>
chip_gen: v7x
topology: tpu7x:2x2x1
jax: 0.10.0
libtpu: 0.0.40
codegen_flags: <defaults>
</compile_context>

<pallas_src>
import math
import numpy as np
import jax
import jax.numpy as jnp
from jax.experimental import pallas as pl
from jax.experimental.pallas import tpu as pltpu

# Small, TPU-friendly shapes (module uses 768; we use H=128 to stay lane-aligned).
B = 2            # batch
S = 8            # sequence length
H = 128          # hidden size (stands in for 768)
O = 8            # output_dim (number of relation classes)
L = 2            # num_gcn_layers


def regsn_kernel(flag_ref, labels_ref,                       # SMEM scalars
                 x_ref, valid_ref, dep_ref, e1_ref, e2_ref,  # VMEM activations / masks
                 gcn_w_ref, gcn_b_ref, w1a_ref, w1b_ref, b1_ref, w2_ref, b2_ref,
                 ent_ref, logits_ref, ce_ref):
    x = x_ref[...]                                    # [B, S, H] f32
    vi = valid_ref[...]                               # [B, S]    i32
    adj = dep_ref[...]                                # [B, S, S] f32

    # ---- valid_filter: compact rows with valid_ids == 1 to the front ----------
    # Exact int32 index math (no float-equality on cumulative sums).
    ii = jax.lax.broadcasted_iota(jnp.int32, (S, S), 0)
    kk = jax.lax.broadcasted_iota(jnp.int32, (S, S), 1)
    ltri = (kk <= ii).astype(jnp.int32)                                   # [S, S]
    csum = jnp.sum(vi[:, None, :] * ltri[None, :, :], axis=-1) - 1        # [B, S] dest row
    new_pos = jax.lax.broadcasted_iota(jnp.int32, (B, S, S), 1)           # j index
    perm = ((csum[:, None, :] == new_pos) &
            (vi[:, None, :] > 0)).astype(jnp.bfloat16)                    # [B, Snew, Sold]
    xv = jnp.einsum('bji,bih->bjh', perm, x.astype(jnp.bfloat16),
                    preferred_element_type=jnp.float32)                   # [B, S, H] f32

    # ---- GCN layers: relu(adj_norm @ (X W) + b), adjacency normalized once ----
    inv_denom = pl.reciprocal(jnp.sum(adj, axis=2, keepdims=True) + 1.0,
                              approx=True)                                # [B, S, 1]
    adj_n = (adj * inv_denom).astype(jnp.bfloat16)                        # [B, S, S]
    gcn_b = gcn_b_ref[...]                                                # [L, H] f32

    h2 = xv.reshape(B * S, H)              # flatten batch: one MXU call per layer for X@W
    for l in range(L):
        hw = jnp.dot(h2.astype(jnp.bfloat16), gcn_w_ref[l],
                     preferred_element_type=jnp.float32)                  # [B*S, H]
        hw3 = hw.reshape(B, S, H).astype(jnp.bfloat16)
        out = jnp.einsum('bst,bth->bsh', adj_n, hw3,
                         preferred_element_type=jnp.float32)              # [B, S, H]
        out = out + gcn_b[l][None, None, :]
        h2 = jnp.maximum(out, 0.0).reshape(B * S, H)
    h = h2.reshape(B, S, H)

    # if max(valid_ids) > 0 and max(dep_matrix) > 0: GCN branch, else passthrough.
    # Condition is batch-global & input-only -> computed in the wrapper, read from SMEM.
    use_gcn = flag_ref[0] > 0
    feat = jnp.where(use_gcn, h, x)                                       # [B, S, H]

    # ---- masked max pooling over the sequence axis (single select) -------------
    def max_pool(mask_ref):
        m = mask_ref[...]                                                 # [B, S]
        return jnp.max(jnp.where(m[:, :, None] > 0.0, feat, -1000.0), axis=1)  # [B, H]

    e1_h = max_pool(e1_ref)
    e2_h = max_pool(e2_ref)
    # ent = concat(e1_h, e2_h) written as two lane-aligned (128-wide) slice stores.
    ent_ref[:, :H] = e1_h
    ent_ref[:, H:] = e2_h

    # ---- classifier: Linear(2H->H) -> ReLU -> Linear(H->O) ---------------------
    # W1 is pre-split into two HxH halves so no lane-axis concatenate is needed.
    hcls = jnp.maximum(
        jnp.dot(e1_h.astype(jnp.bfloat16), w1a_ref[...],
                preferred_element_type=jnp.float32)
        + jnp.dot(e2_h.astype(jnp.bfloat16), w1b_ref[...],
                  preferred_element_type=jnp.float32)
        + b1_ref[0, :], 0.0)                                              # [B, H]
    logits = jnp.dot(hcls.astype(jnp.bfloat16), w2_ref[...],
                     preferred_element_type=jnp.float32) + b2_ref[0, :]   # [B, O]
    logits_ref[...] = logits

    # ---- cross entropy (mean over batch); labels from SMEM, loss to SMEM -------
    lmax = jnp.max(logits, axis=-1, keepdims=True)
    lse = jnp.log(jnp.sum(jnp.exp(logits - lmax), axis=-1, keepdims=True)) + lmax
    logp = logits - lse                                                   # [B, O]
    col = jax.lax.broadcasted_iota(jnp.int32, (1, O), 1)
    ce = jnp.float32(0.0)
    for b in range(B):                                 # B is tiny & static -> unrolled
        onehot = (col == labels_ref[b]).astype(jnp.float32)               # [1, O]
        ce = ce - jnp.sum(onehot * logp[b:b + 1, :])
    ce_ref[0] = ce / B


def regsn_forward(x, valid_ids, dep, e1, e2, labels,
                  gcn_w, gcn_b, cls_w1, cls_b1, cls_w2, cls_b2):
    """Glue: hoist the scalar gate, ship weights as bf16, call the Pallas kernel."""
    # Batch-global gate hoisted out of the kernel (REGSNModel: valid AND dep non-zero).
    use_gcn = ((jnp.max(valid_ids) > 0) & (jnp.max(dep) > 0.0)).astype(jnp.int32).reshape(1)
    labels_i = labels.astype(jnp.int32)

    # MXU operands stored as bf16 (halves HBM/VMEM bytes for the weights);
    # accumulation stays f32 inside the kernel.
    gcn_w_bf = gcn_w.astype(jnp.bfloat16)               # [L, H, H]
    w1a = cls_w1[:H, :].astype(jnp.bfloat16)            # [H, H]  (first half of 2H)
    w1b = cls_w1[H:, :].astype(jnp.bfloat16)            # [H, H]  (second half of 2H)
    w2 = cls_w2.astype(jnp.bfloat16)                    # [H, O]
    b1 = cls_b1[None, :]                                # [1, H] f32
    b2 = cls_b2[None, :]                                # [1, O] f32

    vmem = pl.BlockSpec(memory_space=pltpu.MemorySpace.VMEM)
    smem = pl.BlockSpec(memory_space=pltpu.MemorySpace.SMEM)
    ent, logits, ce = pl.pallas_call(
        regsn_kernel,
        out_shape=(
            jax.ShapeDtypeStruct((B, 2 * H), jnp.float32),
            jax.ShapeDtypeStruct((B, O), jnp.float32),
            jax.ShapeDtypeStruct((1,), jnp.float32),
        ),
        in_specs=[smem, smem] + [vmem] * 12,
        out_specs=(vmem, vmem, smem),
    )(use_gcn, labels_i, x, valid_ids.astype(jnp.int32), dep, e1, e2,
      gcn_w_bf, gcn_b, w1a, w1b, b1, w2, b2)
    return ent, logits, ce[0]


def reference_forward(x, valid_ids, dep, e1, e2, labels,
                      gcn_w, gcn_b, cls_w1, cls_b1, cls_w2, cls_b2):
    """Pure JAX/numpy reference mirroring the PyTorch REGSNModel semantics (eval mode)."""
    xn = np.asarray(x)
    vn = np.asarray(valid_ids)
    xv = np.zeros_like(xn)
    for b in range(B):
        rows = xn[b][vn[b] == 1]
        xv[b, :rows.shape[0]] = rows
    use_gcn = bool(np.max(vn) > 0) and bool(np.max(np.asarray(dep)) > 0)
    h = jnp.asarray(xv)
    denom = jnp.sum(dep, axis=2, keepdims=True) + 1.0
    for l in range(L):
        hw = jnp.einsum('bsh,hd->bsd', h, gcn_w[l])
        out = jnp.einsum('bst,bth->bsh', dep, hw) / denom + gcn_b[l][None, None, :]
        h = jnp.maximum(out, 0.0)
    feat = h if use_gcn else x

    def mp(m):
        return jnp.max(jnp.where(m[:, :, None] > 0, feat, -1000.0), axis=1)

    ent = jnp.concatenate([mp(e1), mp(e2)], axis=-1)
    hc = jnp.maximum(ent @ cls_w1 + cls_b1, 0.0)
    logits = hc @ cls_w2 + cls_b2
    logp = jax.nn.log_softmax(logits, axis=-1)
    onehot = jax.nn.one_hot(labels, O)
    ce = -jnp.mean(jnp.sum(onehot * logp, axis=-1))
    return ent, logits, ce


if __name__ == "__main__":
    key = jax.random.PRNGKey(0)
    ks = jax.random.split(key, 12)

    # ---- deterministic parameters (shapes from the module __init__) -----------
    # Weights are bf16-representable (round-trip) so the kernel's bf16 MXU operands
    # match the f32 reference weights exactly; remaining error is activation rounding.
    def bf16_roundtrip(a):
        return a.astype(jnp.bfloat16).astype(jnp.float32)

    gcn_w = bf16_roundtrip(jax.random.normal(ks[0], (L, H, H), jnp.float32) / math.sqrt(H))
    gcn_b = jax.random.normal(ks[1], (L, H), jnp.float32) * 0.01
    cls_w1 = bf16_roundtrip(jax.random.normal(ks[2], (2 * H, H), jnp.float32)
                            / math.sqrt(2 * H))
    cls_b1 = jax.random.normal(ks[3], (H,), jnp.float32) * 0.01
    cls_w2 = bf16_roundtrip(jax.random.normal(ks[4], (H, O), jnp.float32) / math.sqrt(H))
    cls_b2 = jax.random.normal(ks[5], (O,), jnp.float32) * 0.01

    # ---- deterministic example inputs ------------------------------------------
    # Synthetic encoder last_hidden_state (stand-in for BERT output).
    x = jax.random.normal(ks[6], (B, S, H), jnp.float32)
    valid_np = (np.asarray(jax.random.uniform(ks[7], (B, S))) > 0.3).astype(np.int32)
    valid_np[:, 0] = 1  # ensure at least one valid token per example
    valid_ids = jnp.asarray(valid_np)
    dep_np = (np.asarray(jax.random.uniform(ks[8], (B, S, S))) > 0.6).astype(np.float32)
    dep_np = np.maximum(dep_np, np.transpose(dep_np, (0, 2, 1)))
    for b in range(B):
        np.fill_diagonal(dep_np[b], 1.0)
    dep = jnp.asarray(dep_np)
    e1 = jnp.zeros((B, S), jnp.float32).at[:, 1:3].set(1.0)
    e2 = jnp.zeros((B, S), jnp.float32).at[:, 4:6].set(1.0)
    labels = jax.random.randint(ks[9], (B,), 0, O, jnp.int32)

    ent, logits, ce = regsn_forward(x, valid_ids, dep, e1, e2, labels,
                                    gcn_w, gcn_b, cls_w1, cls_b1, cls_w2, cls_b2)
    jax.block_until_ready((ent, logits, ce))

    ent_r, logits_r, ce_r = reference_forward(x, valid_ids, dep, e1, e2, labels,
                                              gcn_w, gcn_b, cls_w1, cls_b1,
                                              cls_w2, cls_b2)
    assert ent.shape == (B, 2 * H) and logits.shape == (B, O)
    # bf16 MXU operands with f32 accumulation + approx reciprocal -> few-percent tolerance.
    assert jnp.allclose(ent, ent_r, rtol=3e-2, atol=3e-2)
    assert jnp.allclose(logits, logits_r, rtol=3e-2, atol=3e-2)
    assert jnp.allclose(ce, ce_r, rtol=3e-2, atol=3e-2)

    print("KERNEL_OK")
</pallas_src>

<mosaic_0001>
module attributes {stable_mosaic.version = 11 : i64} {
  func.func @regsn_kernel(%arg0: memref<1xi32, #tpu.memory_space<smem>>, %arg1: memref<2xi32, #tpu.memory_space<smem>>, %arg2: memref<2x8x128xf32, #tpu.memory_space<vmem>>, %arg3: memref<2x8xi32, #tpu.memory_space<vmem>>, %arg4: memref<2x8x8xf32, #tpu.memory_space<vmem>>, %arg5: memref<2x8xf32, #tpu.memory_space<vmem>>, %arg6: memref<2x8xf32, #tpu.memory_space<vmem>>, %arg7: memref<2x128x128xbf16, #tpu.memory_space<vmem>>, %arg8: memref<2x128xf32, #tpu.memory_space<vmem>>, %arg9: memref<128x128xbf16, #tpu.memory_space<vmem>>, %arg10: memref<128x128xbf16, #tpu.memory_space<vmem>>, %arg11: memref<1x128xf32, #tpu.memory_space<vmem>>, %arg12: memref<128x8xbf16, #tpu.memory_space<vmem>>, %arg13: memref<1x8xf32, #tpu.memory_space<vmem>>, %arg14: memref<2x256xf32, #tpu.memory_space<vmem>>, %arg15: memref<2x8xf32, #tpu.memory_space<vmem>>, %arg16: memref<1xf32, #tpu.memory_space<smem>>) attributes {dimension_semantics = [], scalar_prefetch = 0 : i64, scratch_operands = 0 : i64, tpu.core_type = #tpu.core_type<tc>} {
    %c0 = arith.constant 0 : index
    %c0_0 = arith.constant 0 : index
    %c0_1 = arith.constant 0 : index
    %0 = vector.load %arg2[%c0, %c0_0, %c0_1] : memref<2x8x128xf32, #tpu.memory_space<vmem>>, vector<2x8x128xf32>
    %c0_2 = arith.constant 0 : index
    %c0_3 = arith.constant 0 : index
    %1 = vector.load %arg3[%c0_2, %c0_3] : memref<2x8xi32, #tpu.memory_space<vmem>>, vector<2x8xi32>
    %c0_4 = arith.constant 0 : index
    %c0_5 = arith.constant 0 : index
    %c0_6 = arith.constant 0 : index
    %2 = vector.load %arg4[%c0_4, %c0_5, %c0_6] : memref<2x8x8xf32, #tpu.memory_space<vmem>>, vector<2x8x8xf32>
    %3 = tpu.iota {dimensions = array<i32: 0>} : vector<8x8xi32>
    %4 = tpu.iota {dimensions = array<i32: 1>} : vector<8x8xi32>
    %5 = arith.cmpi sle, %4, %3 : vector<8x8xi32>
    %6 = arith.extui %5 : vector<8x8xi1> to vector<8x8xi32>
    %7 = vector.shape_cast %1 : vector<2x8xi32> to vector<2x1x8xi32>
    %8 = vector.shape_cast %6 : vector<8x8xi32> to vector<1x8x8xi32>
    %9 = vector.broadcast %7 : vector<2x1x8xi32> to vector<2x8x8xi32>
    %10 = vector.broadcast %8 : vector<1x8x8xi32> to vector<2x8x8xi32>
    %11 = arith.muli %9, %10 : vector<2x8x8xi32>
    %cst = arith.constant dense<0> : vector<2x8xi32>
    %12 = vector.multi_reduction <add>, %11, %cst [2] : vector<2x8x8xi32> to vector<2x8xi32>
    %c1_i32 = arith.constant 1 : i32
    %13 = vector.broadcast %c1_i32 : i32 to vector<2x8xi32>
    %14 = arith.subi %12, %13 : vector<2x8xi32>
    %15 = tpu.iota {dimensions = array<i32: 1>} : vector<2x8x8xi32>
    %16 = vector.shape_cast %14 : vector<2x8xi32> to vector<2x1x8xi32>
    %17 = vector.broadcast %16 : vector<2x1x8xi32> to vector<2x8x8xi32>
    %18 = arith.cmpi eq, %17, %15 : vector<2x8x8xi32>
    %19 = vector.shape_cast %1 : vector<2x8xi32> to vector<2x1x8xi32>
    %c0_i32 = arith.constant 0 : i32
    %20 = vector.broadcast %c0_i32 : i32 to vector<2x1x8xi32>
    %21 = arith.cmpi sgt, %19, %20 : vector<2x1x8xi32>
    %22 = vector.broadcast %21 : vector<2x1x8xi1> to vector<2x8x8xi1>
    %23 = arith.andi %18, %22 : vector<2x8x8xi1>
    %24 = arith.extui %23 : vector<2x8x8xi1> to vector<2x8x8xi32>
    %25 = arith.sitofp %24 : vector<2x8x8xi32> to vector<2x8x8xf32>
    %26 = arith.truncf %25 : vector<2x8x8xf32> to vector<2x8x8xbf16>
    %27 = arith.truncf %0 : vector<2x8x128xf32> to vector<2x8x128xbf16>
    "tpu.trace_start"() <{level = 10 : i32, message = "bji,bih->bjh"}> : () -> ()
    %cst_7 = arith.constant dense<0.000000e+00> : vector<2x8x128xf32>
    %28 = tpu.matmul %26, %27, %cst_7 {dimension_numbers = #tpu.dot_dimension_numbers<[2], [1], [1], [2], [0, 0, 0, 1, 1, 2], [0], [0]>} : vector<2x8x8xbf16>, vector<2x8x128xbf16>, vector<2x8x128xf32> -> vector<2x8x128xf32>
    "tpu.trace_stop"() : () -> ()
    %cst_8 = arith.constant dense<0.000000e+00> : vector<2x8xf32>
    %29 = vector.multi_reduction <add>, %2, %cst_8 [2] : vector<2x8x8xf32> to vector<2x8xf32>
    %30 = vector.shape_cast %29 : vector<2x8xf32> to vector<2x8x1xf32>
    %cst_9 = arith.constant 1.000000e+00 : f32
    %31 = vector.broadcast %cst_9 : f32 to vector<2x8x1xf32>
    %32 = arith.addf %30, %31 : vector<2x8x1xf32>
    %33 = tpu.reciprocal %32 {approx = true} : vector<2x8x1xf32> -> vector<2x8x1xf32>
    %34 = vector.broadcast %33 : vector<2x8x1xf32> to vector<2x8x8xf32>
    %35 = arith.mulf %2, %34 : vector<2x8x8xf32>
    %36 = arith.truncf %35 : vector<2x8x8xf32> to vector<2x8x8xbf16>
    %c0_10 = arith.constant 0 : index
    %c0_11 = arith.constant 0 : index
    %37 = vector.load %arg8[%c0_10, %c0_11] : memref<2x128xf32, #tpu.memory_space<vmem>>, vector<2x128xf32>
    %38 = vector.shape_cast %28 : vector<2x8x128xf32> to vector<16x128xf32>
    %39 = arith.truncf %38 : vector<16x128xf32> to vector<16x128xbf16>
    %c0_12 = arith.constant 0 : index
    %c0_13 = arith.constant 0 : index
    %c0_14 = arith.constant 0 : index
    %40 = vector.load %arg7[%c0_12, %c0_13, %c0_14] : memref<2x128x128xbf16, #tpu.memory_space<vmem>>, vector<1x128x128xbf16>
    %41 = vector.shape_cast %40 : vector<1x128x128xbf16> to vector<128x128xbf16>
    %cst_15 = arith.constant dense<0.000000e+00> : vector<16x128xf32>
    %42 = tpu.matmul %39, %41, %cst_15 {dimension_numbers = #tpu.dot_dimension_numbers<[1], [0], [0], [1], [0, 0, 1, 1], [], []>} : vector<16x128xbf16>, vector<128x128xbf16>, vector<16x128xf32> -> vector<16x128xf32>
    %43 = vector.shape_cast %42 : vector<16x128xf32> to vector<2x8x128xf32>
    %44 = arith.truncf %43 : vector<2x8x128xf32> to vector<2x8x128xbf16>
    "tpu.trace_start"() <{level = 10 : i32, message = "bst,bth->bsh"}> : () -> ()
    %cst_16 = arith.constant dense<0.000000e+00> : vector<2x8x128xf32>
    %45 = tpu.matmul %36, %44, %cst_16 {dimension_numbers = #tpu.dot_dimension_numbers<[2], [1], [1], [2], [0, 0, 0, 1, 1, 2], [0], [0]>} : vector<2x8x8xbf16>, vector<2x8x128xbf16>, vector<2x8x128xf32> -> vector<2x8x128xf32>
    "tpu.trace_stop"() : () -> ()
    %46 = vector.extract_strided_slice %37 {offsets = [0, 0], sizes = [1, 128], strides = [1, 1]} : vector<2x128xf32> to vector<1x128xf32>
    %47 = vector.shape_cast %46 : vector<1x128xf32> to vector<128xf32>
    %48 = vector.shape_cast %47 : vector<128xf32> to vector<1x1x128xf32>
    %49 = vector.broadcast %48 : vector<1x1x128xf32> to vector<2x8x128xf32>
    %50 = arith.addf %45, %49 : vector<2x8x128xf32>
    %cst_17 = arith.constant 0.000000e+00 : f32
    %51 = vector.broadcast %cst_17 : f32 to vector<2x8x128xf32>
    %52 = arith.maximumf %50, %51 : vector<2x8x128xf32>
    %53 = vector.shape_cast %52 : vector<2x8x128xf32> to vector<16x128xf32>
    %54 = arith.truncf %53 : vector<16x128xf32> to vector<16x128xbf16>
    %c1 = arith.constant 1 : index
    %c0_18 = arith.constant 0 : index
    %c0_19 = arith.constant 0 : index
    %55 = vector.load %arg7[%c1, %c0_18, %c0_19] : memref<2x128x128xbf16, #tpu.memory_space<vmem>>, vector<1x128x128xbf16>
    %56 = vector.shape_cast %55 : vector<1x128x128xbf16> to vector<128x128xbf16>
    %cst_20 = arith.constant dense<0.000000e+00> : vector<16x128xf32>
    %57 = tpu.matmul %54, %56, %cst_20 {dimension_numbers = #tpu.dot_dimension_numbers<[1], [0], [0], [1], [0, 0, 1, 1], [], []>} : vector<16x128xbf16>, vector<128x128xbf16>, vector<16x128xf32> -> vector<16x128xf32>
    %58 = vector.shape_cast %57 : vector<16x128xf32> to vector<2x8x128xf32>
    %59 = arith.truncf %58 : vector<2x8x128xf32> to vector<2x8x128xbf16>
    "tpu.trace_start"() <{level = 10 : i32, message = "bst,bth->bsh"}> : () -> ()
    %cst_21 = arith.constant dense<0.000000e+00> : vector<2x8x128xf32>
    %60 = tpu.matmul %36, %59, %cst_21 {dimension_numbers = #tpu.dot_dimension_numbers<[2], [1], [1], [2], [0, 0, 0, 1, 1, 2], [0], [0]>} : vector<2x8x8xbf16>, vector<2x8x128xbf16>, vector<2x8x128xf32> -> vector<2x8x128xf32>
    "tpu.trace_stop"() : () -> ()
    %61 = vector.extract_strided_slice %37 {offsets = [1, 0], sizes = [1, 128], strides = [1, 1]} : vector<2x128xf32> to vector<1x128xf32>
    %62 = vector.shape_cast %61 : vector<1x128xf32> to vector<128xf32>
    %63 = vector.shape_cast %62 : vector<128xf32> to vector<1x1x128xf32>
    %64 = vector.broadcast %63 : vector<1x1x128xf32> to vector<2x8x128xf32>
    %65 = arith.addf %60, %64 : vector<2x8x128xf32>
    %cst_22 = arith.constant 0.000000e+00 : f32
    %66 = vector.broadcast %cst_22 : f32 to vector<2x8x128xf32>
    %67 = arith.maximumf %65, %66 : vector<2x8x128xf32>
    %68 = vector.shape_cast %67 : vector<2x8x128xf32> to vector<16x128xf32>
    %69 = vector.shape_cast %68 : vector<16x128xf32> to vector<2x8x128xf32>
    %c0_23 = arith.constant 0 : index
    %70 = memref.load %arg0[%c0_23] : memref<1xi32, #tpu.memory_space<smem>>
    %c0_i32_24 = arith.constant 0 : i32
    %71 = arith.cmpi sgt, %70, %c0_i32_24 : i32
    %72 = arith.select %71, %69, %0 : vector<2x8x128xf32>
    %c0_25 = arith.constant 0 : index
    %c0_26 = arith.constant 0 : index
    %73 = vector.load %arg5[%c0_25, %c0_26] : memref<2x8xf32, #tpu.memory_space<vmem>>, vector<2x8xf32>
    %74 = vector.shape_cast %73 : vector<2x8xf32> to vector<2x8x1xf32>
    %cst_27 = arith.constant 0.000000e+00 : f32
    %75 = vector.broadcast %cst_27 : f32 to vector<2x8x1xf32>
    %76 = arith.cmpf ogt, %74, %75 : vector<2x8x1xf32>
    %cst_28 = arith.constant -1.000000e+03 : f32
    %77 = vector.shape_cast %76 : vector<2x8x1xi1> to vector<2x8x1xi1>
    %78 = vector.broadcast %77 : vector<2x8x1xi1> to vector<2x8x128xi1>
    %79 = vector.broadcast %cst_28 : f32 to vector<2x8x128xf32>
    %80 = arith.select %78, %72, %79 : vector<2x8x128xi1>, vector<2x8x128xf32>
    %cst_29 = arith.constant dense<0xFF800000> : vector<2x128xf32>
    %81 = vector.multi_reduction <maximumf>, %80, %cst_29 [1] : vector<2x8x128xf32> to vector<2x128xf32>
    %c0_30 = arith.constant 0 : index
    %c0_31 = arith.constant 0 : index
    %82 = vector.load %arg6[%c0_30, %c0_31] : memref<2x8xf32, #tpu.memory_space<vmem>>, vector<2x8xf32>
    %83 = vector.shape_cast %82 : vector<2x8xf32> to vector<2x8x1xf32>
    %cst_32 = arith.constant 0.000000e+00 : f32
    %84 = vector.broadcast %cst_32 : f32 to vector<2x8x1xf32>
    %85 = arith.cmpf ogt, %83, %84 : vector<2x8x1xf32>
    %cst_33 = arith.constant -1.000000e+03 : f32
    %86 = vector.shape_cast %85 : vector<2x8x1xi1> to vector<2x8x1xi1>
    %87 = vector.broadcast %86 : vector<2x8x1xi1> to vector<2x8x128xi1>
    %88 = vector.broadcast %cst_33 : f32 to vector<2x8x128xf32>
    %89 = arith.select %87, %72, %88 : vector<2x8x128xi1>, vector<2x8x128xf32>
    %cst_34 = arith.constant dense<0xFF800000> : vector<2x128xf32>
    %90 = vector.multi_reduction <maximumf>, %89, %cst_34 [1] : vector<2x8x128xf32> to vector<2x128xf32>
    %c0_35 = arith.constant 0 : index
    %c0_36 = arith.constant 0 : index
    %91 = vector.load %arg14[%c0_35, %c0_36] : memref<2x256xf32, #tpu.memory_space<vmem>>, vector<2x128xf32>
    tpu.vector_store %arg14[%c0_35, %c0_36], %81 {strides = array<i32>} : memref<2x256xf32, #tpu.memory_space<vmem>>, vector<2x128xf32>,
    %c0_37 = arith.constant 0 : index
    %c128 = arith.constant 128 : index
    %92 = vector.load %arg14[%c0_37, %c128] : memref<2x256xf32, #tpu.memory_space<vmem>>, vector<2x128xf32>
    tpu.vector_store %arg14[%c0_37, %c128], %90 {strides = array<i32>} : memref<2x256xf32, #tpu.memory_space<vmem>>, vector<2x128xf32>,
    %93 = arith.truncf %81 : vector<2x128xf32> to vector<2x128xbf16>
    %c0_38 = arith.constant 0 : index
    %c0_39 = arith.constant 0 : index
    %94 = vector.load %arg9[%c0_38, %c0_39] : memref<128x128xbf16, #tpu.memory_space<vmem>>, vector<128x128xbf16>
    %cst_40 = arith.constant dense<0.000000e+00> : vector<2x128xf32>
    %95 = tpu.matmul %93, %94, %cst_40 {dimension_numbers = #tpu.dot_dimension_numbers<[1], [0], [0], [1], [0, 0, 1, 1], [], []>} : vector<2x128xbf16>, vector<128x128xbf16>, vector<2x128xf32> -> vector<2x128xf32>
    %96 = arith.truncf %90 : vector<2x128xf32> to vector<2x128xbf16>
    %c0_41 = arith.constant 0 : index
    %c0_42 = arith.constant 0 : index
    %97 = vector.load %arg10[%c0_41, %c0_42] : memref<128x128xbf16, #tpu.memory_space<vmem>>, vector<128x128xbf16>
    %cst_43 = arith.constant dense<0.000000e+00> : vector<2x128xf32>
    %98 = tpu.matmul %96, %97, %cst_43 {dimension_numbers = #tpu.dot_dimension_numbers<[1], [0], [0], [1], [0, 0, 1, 1], [], []>} : vector<2x128xbf16>, vector<128x128xbf16>, vector<2x128xf32> -> vector<2x128xf32>
    %99 = arith.addf %95, %98 : vector<2x128xf32>
    %c0_44 = arith.constant 0 : index
    %c0_45 = arith.constant 0 : index
    %100 = vector.load %arg11[%c0_44, %c0_45] : memref<1x128xf32, #tpu.memory_space<vmem>>, vector<1x128xf32>
    %101 = vector.shape_cast %100 : vector<1x128xf32> to vector<128xf32>
    %102 = vector.shape_cast %101 : vector<128xf32> to vector<1x128xf32>
    %103 = vector.broadcast %102 : vector<1x128xf32> to vector<2x128xf32>
    %104 = arith.addf %99, %103 : vector<2x128xf32>
    %cst_46 = arith.constant 0.000000e+00 : f32
    %105 = vector.broadcast %cst_46 : f32 to vector<2x128xf32>
    %106 = arith.maximumf %104, %105 : vector<2x128xf32>
    %107 = arith.truncf %106 : vector<2x128xf32> to vector<2x128xbf16>
    %c0_47 = arith.constant 0 : index
    %c0_48 = arith.constant 0 : index
    %108 = vector.load %arg12[%c0_47, %c0_48] : memref<128x8xbf16, #tpu.memory_space<vmem>>, vector<128x8xbf16>
    %cst_49 = arith.constant dense<0.000000e+00> : vector<2x8xf32>
    %109 = tpu.matmul %107, %108, %cst_49 {dimension_numbers = #tpu.dot_dimension_numbers<[1], [0], [0], [1], [0, 0, 1, 1], [], []>} : vector<2x128xbf16>, vector<128x8xbf16>, vector<2x8xf32> -> vector<2x8xf32>
    %c0_50 = arith.constant 0 : index
    %c0_51 = arith.constant 0 : index
    %110 = vector.load %arg13[%c0_50, %c0_51] : memref<1x8xf32, #tpu.memory_space<vmem>>, vector<1x8xf32>
    %111 = vector.shape_cast %110 : vector<1x8xf32> to vector<8xf32>
    %112 = vector.shape_cast %111 : vector<8xf32> to vector<1x8xf32>
    %113 = vector.broadcast %112 : vector<1x8xf32> to vector<2x8xf32>
    %114 = arith.addf %109, %113 : vector<2x8xf32>
    %c0_52 = arith.constant 0 : index
    %c0_53 = arith.constant 0 : index
    %115 = vector.load %arg15[%c0_52, %c0_53] : memref<2x8xf32, #tpu.memory_space<vmem>>, vector<2x8xf32>
    tpu.vector_store %arg15[%c0_52, %c0_53], %114 {strides = array<i32>} : memref<2x8xf32, #tpu.memory_space<vmem>>, vector<2x8xf32>,
    %cst_54 = arith.constant dense<0xFF800000> : vector<2xf32>
    %116 = vector.multi_reduction <maximumf>, %114, %cst_54 [1] : vector<2x8xf32> to vector<2xf32>
    %117 = vector.shape_cast %116 : vector<2xf32> to vector<2x1xf32>
    %118 = vector.broadcast %117 : vector<2x1xf32> to vector<2x8xf32>
    %119 = arith.subf %114, %118 : vector<2x8xf32>
    %120 = math.exp %119 : vector<2x8xf32>
    %cst_55 = arith.constant dense<0.000000e+00> : vector<2xf32>
    %121 = vector.multi_reduction <add>, %120, %cst_55 [1] : vector<2x8xf32> to vector<2xf32>
    %122 = vector.shape_cast %121 : vector<2xf32> to vector<2x1xf32>
    %123 = math.log %122 : vector<2x1xf32>
    %124 = arith.addf %123, %117 : vector<2x1xf32>
    %125 = vector.broadcast %124 : vector<2x1xf32> to vector<2x8xf32>
    %126 = arith.subf %114, %125 : vector<2x8xf32>
    %127 = tpu.iota {dimensions = array<i32: 1>} : vector<1x8xi32>
    %c0_56 = arith.constant 0 : index
    %128 = memref.load %arg1[%c0_56] : memref<2xi32, #tpu.memory_space<smem>>
    %129 = vector.broadcast %128 : i32 to vector<1x8xi32>
    %130 = arith.cmpi eq, %127, %129 : vector<1x8xi32>
    %131 = arith.extui %130 : vector<1x8xi1> to vector<1x8xi32>
    %132 = arith.sitofp %131 : vector<1x8xi32> to vector<1x8xf32>
    %133 = vector.extract_strided_slice %126 {offsets = [0, 0], sizes = [1, 8], strides = [1, 1]} : vector<2x8xf32> to vector<1x8xf32>
    %134 = arith.mulf %132, %133 : vector<1x8xf32>
    %135 = vector.shape_cast %134 : vector<1x8xf32> to vector<1x1x8xf32>
    %cst_57 = arith.constant dense<0.000000e+00> : vector<1xf32>
    %136 = vector.multi_reduction <add>, %135, %cst_57 [1, 2] : vector<1x1x8xf32> to vector<1xf32>
    %137 = vector.shape_cast %136 : vector<1xf32> to vector<1x1x1xf32>
    %138 = vector.extract %137[0, 0, 0] : f32 from vector<1x1x1xf32>
    %cst_58 = arith.constant 0.000000e+00 : f32
    %139 = arith.subf %cst_58, %138 : f32
    %c1_59 = arith.constant 1 : index
    %140 = memref.load %arg1[%c1_59] : memref<2xi32, #tpu.memory_space<smem>>
    %141 = vector.broadcast %140 : i32 to vector<1x8xi32>
    %142 = arith.cmpi eq, %127, %141 : vector<1x8xi32>
    %143 = arith.extui %142 : vector<1x8xi1> to vector<1x8xi32>
    %144 = arith.sitofp %143 : vector<1x8xi32> to vector<1x8xf32>
    %145 = vector.extract_strided_slice %126 {offsets = [1, 0], sizes = [1, 8], strides = [1, 1]} : vector<2x8xf32> to vector<1x8xf32>
    %146 = arith.mulf %144, %145 : vector<1x8xf32>
    %147 = vector.shape_cast %146 : vector<1x8xf32> to vector<1x1x8xf32>
    %cst_60 = arith.constant dense<0.000000e+00> : vector<1xf32>
    %148 = vector.multi_reduction <add>, %147, %cst_60 [1, 2] : vector<1x1x8xf32> to vector<1xf32>
    %149 = vector.shape_cast %148 : vector<1xf32> to vector<1x1x1xf32>
    %150 = vector.extract %149[0, 0, 0] : f32 from vector<1x1x1xf32>
    %151 = arith.subf %139, %150 : f32
    %cst_61 = arith.constant 2.000000e+00 : f32
    %152 = arith.divf %151, %cst_61 : f32
    %c0_62 = arith.constant 0 : index
    %153 = memref.load %arg16[%c0_62] : memref<1xf32, #tpu.memory_space<smem>>
    memref.store %152, %arg16[%c0_62] : memref<1xf32, #tpu.memory_space<smem>>
    return
  }
}

</mosaic_0001>

<bundles_post_ra>
// kernel: tpu_custom_call.1
= control target key start
LH: loop header
LB: loop body
LE: loop exit
PB: predicated region body
PF: predicated region fallthrough
CT: control target
= control target key end

     0   :  { %s2620_s0 = inlined_call_operand.<no memory space> [shape: s32[1], index: 0, kind: input, shape index: {}]   ;;  %s2621_s1 = inlined_call_operand.vmem [shape: s32[2], index: 1, kind: input, shape index: {}]   ;;  %s2622_s2 = inlined_call_operand.vmem [shape: f32[2,8,128], index: 2, kind: input, shape index: {}]   ;;  %s2623_s3 = inlined_call_operand.vmem [shape: s32[2,8], index: 3, kind: input, shape index: {}]   ;;  %s2624_s4 = inlined_call_operand.vmem [shape: f32[2,8,8], index: 4, kind: input, shape index: {}]   ;;  %s2625_s5 = inlined_call_operand.vmem [shape: f32[2,8], index: 5, kind: input, shape index: {}]   ;;  %s2626_s6 = inlined_call_operand.hbm [shape: f32[2,8], index: 6, kind: input, shape index: {}]   ;;  %s2627_s7 = inlined_call_operand.hbm [shape: bf16[2,128,128], index: 7, kind: input, shape index: {}]   ;;  %s2628_s8 = inlined_call_operand.hbm [shape: f32[2,128], index: 8, kind: input, shape index: {}]   ;;  %s2629_s9 = inlined_call_operand.vmem [shape: bf16[128,128], index: 9, kind: input, shape index: {}]   ;;  %s2630_s10 = inlined_call_operand.hbm [shape: bf16[128,128], index: 10, kind: input, shape index: {}]   ;;  %s2631_s11 = inlined_call_operand.vmem [shape: f32[1,128], index: 11, kind: input, shape index: {}]   ;;  %s2632_s12 = inlined_call_operand.vmem [shape: bf16[128,8], index: 12, kind: input, shape index: {}]   ;;  %s2633_s13 = inlined_call_operand.vmem [shape: f32[1,8], index: 13, kind: input, shape index: {}]   ;;  %s2634_s14 = inlined_call_operand.hbm [shape: f32[2,256], index: 14, kind: output, shape index: {0}]   ;;  %s2635_s15 = inlined_call_operand.hbm [shape: f32[2,8], index: 15, kind: output, shape index: {1}]   ;;  %s2636_s16 = inlined_call_operand.hbm [shape: f32[1], index: 16, kind: output, shape index: {2}]  }
   0x1   :  { %2637 = sst [smem:[#allocation25_spill]] %s2620_s0 }
   0x2   :  { %23 = vsyncpa [#allocation7], 0 }
   0x3   :  { %24 = vsyncpa [#allocation4], 0 }
   0x4   :  { %25 = vsyncpa [#allocation10], 0 }
   0x5   :  { %26 = vsyncpa [#allocation13], 0 }
   0x6   :  { %27 = vsyncpa [#allocation5], 0 }
   0x7   :  { %28 = vsyncpa [#allocation16], 0 }
   0x8   :  { %29 = vsyncpa [#allocation6], 0  ;;  %s2088_s21 = smov [#allocation9]   ;;  %s38_s25 = sshll.u32 %s2621_s1, 4  ;;  %s39_s25 = int_to_ptr.vmem [resolvable:$true] %s38_s25 }
   0x9   :  { %s65_s22 = sshll.u32 %s2088_s21, 4  ;;  %s1920_s28 = scalar_lea.hbm %s2627_s7, 2048  ;;  %s66_s22 = int_to_ptr.vmem [resolvable:$true] %s65_s22 }
   0xa   :  { %p1921_p0 = scmp.ne.s32.totalorder %s2627_s7, %s1920_s28  ;;  %p1924_p1 = scmp.lt.u32.totalorder %s1920_s28, %s2627_s7 }
   0xc   :  { %p1926_p2 = pnand %p1924_p1, %p1921_p0 }
   0xe   :  { %1929 = shalt.err (!%p1926_p2)
}
   0xf   :  { %s1930_s18 = scalar_lea.vmem %s66_s22, 2048  ;;  %p1935_p4 = scmp.lt.s32.totalorder %s66_s22, %s66_s22 }
  0x10   :  { %p1931_p3 = scmp.ne.s32.totalorder %s66_s22, %s1930_s18  ;;  %p1936_p5 = scmp.lt.s32.totalorder %s1930_s18, %s1930_s18 }
  0x12   :  { %p1937_p6 = por %p1936_p5, %p1935_p4 }
  0x14   :  { %p1938_p7 = pnand %p1937_p6, %p1931_p3 }
  0x16   :  { %1941 = shalt.err (!%p1938_p7)
}
  0x17   :  { %s2089_s1 = smov 64   ;;  %s2090_s19 = smov 4  }
  0x18   :  { %71 = dma.hbm_to_vmem [thread:$0]  %s2627_s7, 2048, %s66_s22, [#allocation10], %s2089_s1, %s2089_s1, %s2090_s19  }
  0x19   :  { %s1942_s23 = scalar_lea.vmem %s39_s25, 16  ;;  %p1947_p9 = scmp.lt.s32.totalorder %s39_s25, %s39_s25 }
  0x1a   :  { %p1943_p8 = scmp.ne.s32.totalorder %s39_s25, %s1942_s23  ;;  %p1948_p10 = scmp.lt.s32.totalorder %s1942_s23, %s1942_s23 }
  0x1c   :  { %p1949_p11 = por %p1948_p10, %p1947_p9 }
  0x1e   :  { %p1950_p12 = pnand %p1949_p11, %p1943_p8 }
  0x20   :  { %1953 = shalt.err (!%p1950_p12)
}
  0x21   :  { %s2091_s24 = smov [#allocation3]   ;;  %s2092_s26 = smov [#allocation8]  }
  0x22   :  { %41 = dma.vmem_to_smem %s39_s25, 16, %s2091_s24, [#allocation7]  }
  0x23   :  { %s56_s27 = sshll.u32 %s2092_s26, 4  ;;  %s2093_s28 = smov [#allocation11]   ;;  %s57_s27 = int_to_ptr.vmem [resolvable:$true] %s56_s27 }
  0x24   :  { %s78_s29 = sshll.u32 %s2093_s28, 4  ;;  %s1954_s7 = scalar_lea.hbm %s2626_s6, 32  ;;  %s79_s29 = int_to_ptr.vmem [resolvable:$true] %s78_s29 }
  0x25   :  { %p1955_p13 = scmp.ne.s32.totalorder %s2626_s6, %s1954_s7  ;;  %p1958_p0 = scmp.lt.u32.totalorder %s1954_s7, %s2626_s6 }
  0x27   :  { %p1960_p1 = pnand %p1958_p0, %p1955_p13 }
  0x29   :  { %1963 = shalt.err (!%p1960_p1)
}
  0x2a   :  { %s1964_s25 = scalar_lea.vmem %s57_s27, 32  ;;  %p1969_p3 = scmp.lt.s32.totalorder %s57_s27, %s57_s27 }
  0x2b   :  { %p1965_p2 = scmp.ne.s32.totalorder %s57_s27, %s1964_s25  ;;  %p1970_p4 = scmp.lt.s32.totalorder %s1964_s25, %s1964_s25 }
  0x2d   :  { %p1971_p5 = por %p1970_p4, %p1969_p3 }
  0x2f   :  { %p1972_p6 = pnand %p1971_p5, %p1965_p2 }
  0x31   :  { %1975 = shalt.err (!%p1972_p6)
}
  0x32   :  { %59 = dma.hbm_to_vmem [thread:$0]  %s2626_s6, 32, %s57_s27, [#allocation4]  }
  0x33   :  { %s1976_s28 = scalar_lea.hbm %s2628_s8, 32 }
  0x34   :  { %p1977_p7 = scmp.ne.s32.totalorder %s2628_s8, %s1976_s28  ;;  %p1980_p8 = scmp.lt.u32.totalorder %s1976_s28, %s2628_s8 }
  0x36   :  { %p1982_p9 = pnand %p1980_p8, %p1977_p7 }
  0x38   :  { %1985 = shalt.err (!%p1982_p9)
}
  0x39   :  { %s1986_s17 = scalar_lea.vmem %s79_s29, 32  ;;  %p1991_p11 = scmp.lt.s32.totalorder %s79_s29, %s79_s29 }
  0x3a   :  { %p1987_p10 = scmp.ne.s32.totalorder %s79_s29, %s1986_s17  ;;  %p1992_p12 = scmp.lt.s32.totalorder %s1986_s17, %s1986_s17 }
  0x3c   :  { %p1993_p13 = por %p1992_p12, %p1991_p11 }
  0x3e   :  { %p1994_p0 = pnand %p1993_p13, %p1987_p10 }
  0x40   :  { %1997 = shalt.err (!%p1994_p0)
}
  0x41   :  { %81 = dma.hbm_to_vmem [thread:$0]  %s2628_s8, 32, %s79_s29, [#allocation10]  }
  0x42   :  { %s2094_s18 = smov [#allocation12]   ;;  %s1998_s23 = scalar_lea.hbm %s2630_s10, 1024 }
  0x43   :  { %s89_s20 = sshll.u32 %s2094_s18, 4  ;;  %p1999_p1 = scmp.ne.s32.totalorder %s2630_s10, %s1998_s23  ;;  %s90_s20 = int_to_ptr.vmem [resolvable:$true] %s89_s20 }
  0x44   :  { %p2002_p2 = scmp.lt.u32.totalorder %s1998_s23, %s2630_s10 }
  0x46   :  { %p2004_p3 = pnand %p2002_p2, %p1999_p1 }
  0x48   :  { %2007 = shalt.err (!%p2004_p3)
}
  0x49   :  { %s2008_s0 = scalar_lea.vmem %s90_s20, 1024  ;;  %p2013_p5 = scmp.lt.s32.totalorder %s90_s20, %s90_s20 }
  0x4a   :  { %p2009_p4 = scmp.ne.s32.totalorder %s90_s20, %s2008_s0  ;;  %p2014_p6 = scmp.lt.s32.totalorder %s2008_s0, %s2008_s0 }
  0x4c   :  { %p2015_p7 = por %p2014_p6, %p2013_p5 }
  0x4e   :  { %p2016_p8 = pnand %p2015_p7, %p2009_p4 }
  0x50   :  { %2019 = shalt.err (!%p2016_p8)
}
  0x51   :  { %95 = dma.hbm_to_vmem [thread:$0]  %s2630_s10, 1024, %s90_s20, [#allocation13], %s2089_s1, %s2089_s1, %s2090_s19  }
  0x52   :  { %2074 = dma.done.wait [#allocation7], 16  }
  0x53   :  { %2075 = vsyncadd [#allocation7], 4294967280 }
  0x54   :  { %2076 = dma.done.wait [#allocation4], 32  }
  0x55   :  { %2077 = vsyncadd [#allocation4], 4294967264 }
  0x56   :  { %2078 = dma.done.wait [#allocation10], 2080  }
  0x57   :  { %2079 = vsyncadd [#allocation10], 4294965216 }
  0x58   :  { %2080 = dma.done.wait [#allocation13], 1024  }
  0x59   :  { %2081 = vsyncadd [#allocation13], 4294966272 }
  0x5a   :  { %117 = sfence }
  0x5b   :  { %v124_v0 = vlaneseq  ;;  %v1588_v1 = vld.sshfl [vmem:[%s2623_s3] sm:$0x11 pattern:$0x75316420]  ;;  %v2095_v2 = vmov 0   ;;  %vm162_vm1 = vcmask 64512  }
  0x5c   :  { %1870 = vset.pattern.permute.xlu1 %v2095_v2  ;;  %1871 = vset.pattern.permute.xlu0 %v2095_v2  ;;  %v2096_v5 = vmov 1966171168   ;;  %v137_v8 = vcombine.high %v1588_v1, %v1588_v1  ;;  %v2097_v34 = vmov 0.0   ;;  %s2100_s3 = smov [#allocation14]   ;;  %s2101_s1 = smov [#allocation15]  }
  0x5d   :  { %v2248_v3 = vshrl.u32 %v124_v0, 7  ;;  %v2250_v4 = vand.u32 127, %v124_v0  ;;  %v139_v6 = vunpack.c.l.s4 %v2096_v5  ;;  %1721 = vmatprep.subr.bf16.mxu1 %v2097_v34  ;;  %1715 = vmatprep.subr.bf16.mxu0 %v2097_v34  ;;  %s1549_s10 = sshll.u32 %s2100_s3, 4  ;;  %s1559_s19 = sshll.u32 %s2101_s1, 4  ;;  %s1550_s10 = int_to_ptr.vmem [resolvable:$true] %s1549_s10  ;;  %s1560_s19 = int_to_ptr.vmem [resolvable:$true] %s1559_s19 }
  0x5e   :  { %p2025_p11 = scmp.lt.s32.totalorder %s1550_s10, %s1550_s10 }
  0x5f   :  { %vm128_vm0 = vcmp.le.s32.totalorder %v2250_v4, %v2248_v3  ;;  %v140_v7 = vunpack.c.0.s8 %v139_v6  ;;  %v2255_v10 = vsub.s32 0, %v2248_v3  ;;  %v2267_v39 = vsub.s32 1, %v2248_v3 }
  0x60   :  { %v129_v9 = vsel %vm128_vm0, 1, %v2095_v2  ;;  %v201_v40 = vsub.s32 2, %v2248_v3  ;;  %v205_v54 = vsub.s32 3, %v2248_v3  ;;  %v209_v58 = vsub.s32 4, %v2248_v3 }
  0x61   :  { %v143_v11 = vsub.s32 %v140_v7, %v2248_v3  ;;  %v194_v47 = vrot.slane %v2248_v3, %v2255_v10  ;;  %v198_v48 = vrot.slane %v2248_v3, %v2267_v39  ;;  %v213_v5 = vsub.s32 5, %v2248_v3 }
  0x62   :  { %v202_v49 = vrot.slane %v2248_v3, %v201_v40  ;;  %v206_v61 = vrot.slane %v2248_v3, %v205_v54 }
  0x63   :  { %v144_v12 = vrot.slane %v1588_v1, %v143_v11  ;;  %v151_v13 = vrot.slane %v137_v8, %v143_v11 }
  0x65   :  { %v155_v14 = vrot.slane %v144_v12, %v2255_v10  ;;  %v159_v15 = vrot.slane %v151_v13, %v2255_v10  ;;  %vm240_vm2 = vcmp.gt.s32.totalorder %v151_v13, 0  ;;  %vm239_vm3 = vcmp.gt.s32.totalorder %v144_v12, 0 }
  0x66   :  { %v242_v24 = vsel %vm240_vm2, 1, %v2095_v2  ;;  %v241_v30 = vsel %vm239_vm3, 1, %v2095_v2 }
  0x67   :  { %v160_v16 = vmul.u32 %v155_v14, %v129_v9  ;;  %v161_v17 = vmul.u32 %v159_v15, %v129_v9  ;;  %v250_v29 = vrot.slane %v242_v24, %v2255_v10  ;;  %v246_v31 = vrot.slane %v241_v30, %v2255_v10 }
  0x69   :  { %v163_v18 = vsel %vm162_vm1, %v160_v16, 0  ;;  %v176_v19 = vsel %vm162_vm1, %v161_v17, 0  ;;  %vm252_vm4 = vcmp.eq.s32.totalorder %v250_v29, 1  ;;  %vm251_vm5 = vcmp.eq.s32.totalorder %v246_v31, 1 }
  0x6a   :  { %v165_v20 = vshrl.u32 %v163_v18, 16  ;;  %v164_v21 = vand.u32 65535, %v163_v18  ;;  %v178_v22 = vshrl.u32 %v176_v19, 16  ;;  %v177_v23 = vand.u32 65535, %v176_v19 }
  0x6b   :  { %v254_v32 = vsel %vm252_vm4, 1, %v2095_v2  ;;  %v253_v33 = vsel %vm251_vm5, 1, %v2095_v2  ;;  %v210_v2 = vrot.slane %v2248_v3, %v209_v58  ;;  %v214_v16 = vrot.slane %v2248_v3, %v213_v5 }
  0x6c   :  { %v167_v25 = vcvt.s32.f32 %v165_v20  ;;  %v166_v26 = vcvt.s32.f32 %v164_v21  ;;  %v180_v27 = vcvt.s32.f32 %v178_v22  ;;  %v179_v28 = vcvt.s32.f32 %v177_v23 }
  0x6d   :  { %v217_v17 = vsub.s32 6, %v2248_v3 }
  0x6e   :  { %170 = vadd.xlane.f32.xlu0 %v167_v25  ;;  %168 = vadd.xlane.f32.xlu1 %v166_v26  ;;  %v221_v25 = vsub.s32 7, %v2248_v3 }
  0x6f   :  { %v218_v24 = vrot.slane %v2248_v3, %v217_v17 }
  0x72   :  { %183 = vadd.xlane.f32.xlu0 %v180_v27  ;;  %181 = vadd.xlane.f32.xlu1 %v179_v28 }
  0x83   :  { %259 = vbcast.lane.b32.xlu1 %v254_v32, 256  ;;  %v222_v32 = vrot.slane %v2248_v3, %v221_v25 }
  0x88   :  { %256 = vbcast.lane.b32.xlu0 %v253_v33, 256 }
  0xfb   :  { %v171_v35 = vpop.xlane.xlu0 %170  ;;  %v169_v36 = vpop.xlane.xlu1 %168 }
  0xfc   :  { %v173_v37 = vcvt.f32.s32 %v171_v35  ;;  %v172_v38 = vcvt.f32.s32 %v169_v36 }
  0xfe   :  { %v174_v41 = vshll.u32 %v173_v37, 16 }
  0xff   :  { %v184_v42 = vpop.xlane.xlu0 %183  ;;  %v182_v43 = vpop.xlane.xlu1 %181 }
 0x100   :  { %v175_v44 = vadd.s32 %v174_v41, %v172_v38  ;;  %v186_v45 = vcvt.f32.s32 %v184_v42  ;;  %v185_v46 = vcvt.f32.s32 %v182_v43 }
 0x102   :  { %v2275_v50 = vadd.s32 4294967295, %v175_v44  ;;  %v187_v51 = vshll.u32 %v186_v45, 16 }
 0x103   :  { %v2277_v52 = vpop.permute.xlu0 %256  ;;  %v2279_v53 = vpop.permute.xlu1 %259 }
 0x104   :  { %v188_v55 = vadd.s32 %v187_v51, %v185_v46  ;;  %vm261_vm6 = vcmp.ne.s32.totalorder %v2277_v52, 0  ;;  %vm223_vm7 = vcmp.eq.s32.totalorder %v2275_v50, %v194_v47  ;;  %vm224_vm9 = vcmp.eq.s32.totalorder %v2275_v50, %v198_v48 }
 0x105   :  { %vm263_vm8 = vmand %vm223_vm7, %vm261_vm6  ;;  %vm225_vm10 = vcmp.eq.s32.totalorder %v2275_v50, %v202_v49  ;;  %vm262_vm11 = vcmp.ne.s32.totalorder %v2279_v53, 0  ;;  %vm226_vm7 = vcmp.eq.s32.totalorder %v2275_v50, %v206_v61 }
 0x106   :  { %v2288_v56 = vadd.s32 4294967295, %v188_v55  ;;  %v1591_v57 = vsel %vm263_vm8, 1.0, %v2097_v34  ;;  %vm264_vm12 = vmand %vm224_vm9, %vm261_vm6 }
 0x107   :  { %v311_v59 = vpack.c.bf16 %v1591_v57, %v1591_v57  ;;  %v1592_v60 = vsel %vm264_vm12, 1.0, %v2097_v34  ;;  %vm2302_vm0 = vmand %vm225_vm10, %vm261_vm6  ;;  %v2368_v57 = vld [vmem:[%s2622_s2 + $0x8] sm:$0xff] }
 0x108   :  { %vm231_vm13 = vcmp.eq.s32.totalorder %v2288_v56, %v194_v47  ;;  %vm232_vm14 = vcmp.eq.s32.totalorder %v2288_v56, %v198_v48  ;;  %vm233_vm15 = vcmp.eq.s32.totalorder %v2288_v56, %v202_v49  ;;  %v312_v0 = vpack.c.bf16 %v1592_v60, %v1592_v60  ;;  %vm266_vm10 = vmand %vm226_vm7, %vm261_vm6 }
 0x109   :  { %v337_v63 = vunpack.c.l.b16 %v311_v59  ;;  %vm271_vm2 = vmand %vm231_vm13, %vm262_vm11  ;;  %vm234_vm3 = vcmp.eq.s32.totalorder %v2288_v56, %v206_v61  ;;  %vm235_vm9 = vcmp.eq.s32.totalorder %v2288_v56, %v210_v2  ;;  %v1593_v14 = vsel %vm2302_vm0, 1.0, %v2097_v34  ;;  %v2376_v59 = vld [vmem:[%s2622_s2] sm:$0xff]  ;;  %s2640_s2 = sld [smem:[#allocation25_spill]] }
 0x10a   :  { %v1599_v1 = vsel %vm271_vm2, 1.0, %v2097_v34  ;;  %vm272_vm4 = vmand %vm232_vm14, %vm262_vm11  ;;  %v338_v9 = vunpack.c.l.b16 %v312_v0  ;;  %vm227_vm13 = vcmp.eq.s32.totalorder %v2275_v50, %v210_v2  ;;  %vm236_vm14 = vcmp.eq.s32.totalorder %v2288_v56, %v214_v16 }
 0x10b   :  { %346 = vperm.xlu1 %1870, %v337_v63   ;;  %v319_v6 = vpack.c.bf16 %v1599_v1, %v1599_v1  ;;  %v1600_v7 = vsel %vm272_vm4, 1.0, %v2097_v34  ;;  %vm273_vm5 = vmand %vm233_vm15, %vm262_vm11  ;;  %v313_v20 = vpack.c.bf16 %v1593_v14, %v1593_v14  ;;  %v1594_v22 = vsel %vm266_vm10, 1.0, %v2097_v34 }
 0x10c   :  { %v1601_v8 = vsel %vm273_vm5, 1.0, %v2097_v34  ;;  %vm274_vm8 = vmand %vm234_vm3, %vm262_vm11  ;;  %v320_v12 = vpack.c.bf16 %v1600_v7, %v1600_v7  ;;  %vm228_vm2 = vcmp.eq.s32.totalorder %v2275_v50, %v214_v16  ;;  %vm237_vm3 = vcmp.eq.s32.totalorder %v2288_v56, %v218_v24 }
 0x10d   :  { %v471_v11 = vunpack.c.l.b16 %v319_v6  ;;  %v321_v13 = vpack.c.bf16 %v1601_v8, %v1601_v8  ;;  %v1602_v15 = vsel %vm274_vm8, 1.0, %v2097_v34  ;;  %vm275_vm12 = vmand %vm235_vm9, %vm262_vm11  ;;  %v339_v26 = vunpack.c.l.b16 %v313_v20 }
 0x10e   :  { %v472_v18 = vunpack.c.l.b16 %v320_v12  ;;  %v322_v21 = vpack.c.bf16 %v1602_v15, %v1602_v15  ;;  %v1603_v23 = vsel %vm275_vm12, 1.0, %v2097_v34  ;;  %vm267_vm15 = vmand %vm227_vm13, %vm261_vm6  ;;  %v314_v28 = vpack.c.bf16 %v1594_v22, %v1594_v22 }
 0x10f   :  { %349 = vperm.xlu1 %1870, %v338_v9   ;;  %480 = vperm.xlu0 %1871, %v471_v11   ;;  %v473_v19 = vunpack.c.l.b16 %v321_v13  ;;  %vm276_vm0 = vmand %vm236_vm14, %vm262_vm11  ;;  %v323_v29 = vpack.c.bf16 %v1603_v23, %v1603_v23  ;;  %v1595_v30 = vsel %vm267_vm15, 1.0, %v2097_v34  ;;  %vm229_vm7 = vcmp.eq.s32.totalorder %v2275_v50, %v218_v24  ;;  %p1012_p9 = scmp.gt.s32.totalorder %s2640_s2, 0  ;;  %s2020_s2 = scalar_lea.vmem %s1550_s10, 64 }
 0x110   :  { %v474_v27 = vunpack.c.l.b16 %v322_v21  ;;  %v1604_v31 = vsel %vm276_vm0, 1.0, %v2097_v34  ;;  %vm268_vm4 = vmand %vm228_vm2, %vm261_vm6  ;;  %vm238_vm8 = vcmp.eq.s32.totalorder %v2288_v56, %v222_v32  ;;  %v340_v33 = vunpack.c.l.b16 %v314_v28  ;;  %p2021_p10 = scmp.ne.s32.totalorder %s1550_s10, %s2020_s2  ;;  %p2026_p12 = scmp.lt.s32.totalorder %s2020_s2, %s2020_s2 }
 0x111   :  { %vm277_vm5 = vmand %vm237_vm3, %vm262_vm11  ;;  %v475_v35 = vunpack.c.l.b16 %v323_v29  ;;  %v315_v36 = vpack.c.bf16 %v1595_v30, %v1595_v30  ;;  %v324_v37 = vpack.c.bf16 %v1604_v31, %v1604_v31  ;;  %v1596_v38 = vsel %vm268_vm4, 1.0, %v2097_v34  ;;  %s1013_s17 = scalar_select %p1012_p9, 1, 0 }
 0x112   :  { %v1605_v40 = vsel %vm277_vm5, 1.0, %v2097_v34  ;;  %vm269_vm9 = vmand %vm229_vm7, %vm261_vm6  ;;  %vm230_vm12 = vcmp.eq.s32.totalorder %v2275_v50, %v222_v32  ;;  %v316_v43 = vpack.c.bf16 %v1596_v38, %v1596_v38  ;;  %v328_v52 = vpack.c.bf16 %v2368_v57, %v2368_v57  ;;  %p2027_p13 = por %p2026_p12, %p2025_p11 }
 0x113   :  { %483 = vperm.xlu1 %1870, %v472_v18   ;;  %486 = vperm.xlu0 %1871, %v473_v19   ;;  %vm278_vm10 = vmand %vm238_vm8, %vm262_vm11  ;;  %v341_v41 = vunpack.c.l.b16 %v315_v36  ;;  %v476_v42 = vunpack.c.l.b16 %v324_v37  ;;  %v325_v44 = vpack.c.bf16 %v1605_v40, %v1605_v40  ;;  %v1597_v45 = vsel %vm269_vm9, 1.0, %v2097_v34 }
 0x114   :  { %v1606_v46 = vsel %vm278_vm10, 1.0, %v2097_v34  ;;  %vm270_vm13 = vmand %vm230_vm12, %vm261_vm6  ;;  %v342_v47 = vunpack.c.l.b16 %v316_v43  ;;  %v317_v49 = vpack.c.bf16 %v1597_v45, %v1597_v45  ;;  %vm419_vm6 = vcmask 1043456   ;;  %p2028_p0 = pnand %p2027_p13, %p2021_p10 }
 0x115   :  { %v477_v48 = vunpack.c.l.b16 %v325_v44  ;;  %v326_v51 = vpack.c.bf16 %v1606_v46, %v1606_v46  ;;  %v1598_v53 = vsel %vm270_vm13, 1.0, %v2097_v34  ;;  %v547_v58 = vsel %vm419_vm6, %v328_v52, 0  ;;  %v1876_v52 = vld [vmem:[#allocation9 + $0x20] sm:$0xff]  }
 0x116   :  { %v343_v50 = vunpack.c.l.b16 %v317_v49  ;;  %v318_v55 = vpack.c.bf16 %v1598_v53, %v1598_v53  ;;  %1722 = vmatpush3.bf16.msra.mxu1 %v547_v58  ;;  %vm2098_vm11 = vmmov 0   ;;  %v327_v60 = vpack.c.bf16 %v2376_v59, %v2376_v59  ;;  %v1872_v53 = vld [vmem:[#allocation9] sm:$0xff]   ;;  %v1877_v58 = vld [vmem:[#allocation9 + $0x28] sm:$0xff]  }
 0x117   :  { %352 = vperm.xlu1 %1870, %v339_v26   ;;  %489 = vperm.xlu0 %1871, %v474_v27   ;;  %v478_v54 = vunpack.c.l.b16 %v326_v51  ;;  %v371_v9 = vsub.s32 %v2250_v4, %v2248_v3  ;;  %vm401_vm14 = vcmask 1041409   ;;  %vm403_vm15 = vcmask 1042434  }
 0x118   :  { %v344_v56 = vunpack.c.l.b16 %v318_v55  ;;  %1723 = vmatprep.mubr.msk.bf16.mxu1 %vm2098_vm11, %v2097_v34  ;;  %1717 = vmatprep.mubr.msk.bf16.mxu0 %vm2098_vm11, %v2097_v34  ;;  %v421_v61 = vsel %vm419_vm6, %v327_v60, 0  ;;  %vm405_vm0 = vcmask 1043459   ;;  %vm407_vm2 = vcmask 1044484   ;;  %v1874_v55 = vld [vmem:[#allocation9 + $0x10] sm:$0xff]  }
 0x119   :  { %1747 = vmatprep.subr.bf16.mxu1 %v2097_v34  ;;  %1716 = vmatpush3.bf16.msra.mxu0 %v421_v61  ;;  %vm409_vm3 = vcmask 1045509   ;;  %vm411_vm4 = vcmask 1046534   ;;  %vm413_vm5 = vcmask 1047559   ;;  %v1878_v60 = vld [vmem:[#allocation9 + $0x30] sm:$0xff]   ;;  %v1879_v61 = vld [vmem:[#allocation9 + $0x38] sm:$0xff]   ;;  %vm1485_vm12 = vcmask 58368  }
 0x11a   :  { %1727 = vmatprep.subr.bf16.mxu0 %v2097_v34 }
 0x11b   :  { %355 = vperm.xlu1 %1870, %v340_v33   ;;  %492 = vperm.xlu0 %1871, %v475_v35  }
 0x11f   :  { %358 = vperm.xlu1 %1870, %v341_v41   ;;  %495 = vperm.xlu0 %1871, %v476_v42  }
 0x123   :  { %361 = vperm.xlu1 %1870, %v342_v47   ;;  %498 = vperm.xlu0 %1871, %v477_v48  }
 0x127   :  { %364 = vperm.xlu1 %1870, %v343_v50   ;;  %501 = vperm.xlu0 %1871, %v478_v54   ;;  %v1873_v54 = vld [vmem:[#allocation9 + $0x8] sm:$0xff]  }
 0x12b   :  { %367 = vperm.xlu1 %1870, %v344_v56   ;;  %v1875_v56 = vld [vmem:[#allocation9 + $0x18] sm:$0xff]  }
 0x18a   :  { %v347_v62 = vpop.permute.xlu1 %346 }
 0x18b   :  { %v372_v26 = vrot.slane %v347_v62, %v371_v9  ;;  %v122_v62 = vld [vmem:[%s2624_s4] sm:$0xff] }
 0x18e   :  { %v481_v63 = vpop.permute.xlu0 %480  ;;  %v350_v0 = vpop.permute.xlu1 %349 }
 0x18f   :  { %v506_v14 = vrot.slane %v481_v63, %v371_v9  ;;  %v376_v21 = vrot.slane %v350_v0, %v371_v9  ;;  %v123_v63 = vld [vmem:[%s2624_s4 + $0x8] sm:$0xff]  ;;  %v589_v0 = vsel %vm162_vm1, %v122_v62, 0.0 }
 0x190   :  { %590 = vadd.xlane.f32.xlu1 %v589_v0 }
 0x191   :  { %v402_v33 = vsel %vm401_vm14, %v376_v21, %v372_v26 }
 0x192   :  { %v487_v1 = vpop.permute.xlu0 %486  ;;  %v484_v2 = vpop.permute.xlu1 %483 }
 0x193   :  { %v510_v11 = vrot.slane %v484_v2, %v371_v9  ;;  %v514_v15 = vrot.slane %v487_v1, %v371_v9  ;;  %v592_v1 = vsel %vm162_vm1, %v123_v63, 0.0 }
 0x194   :  { %593 = vadd.xlane.f32.xlu0 %v592_v1 }
 0x195   :  { %v535_v16 = vsel %vm401_vm14, %v510_v11, %v506_v14 }
 0x196   :  { %v490_v5 = vpop.permute.xlu0 %489  ;;  %v353_v6 = vpop.permute.xlu1 %352  ;;  %v536_v23 = vsel %vm403_vm15, %v514_v15, %v535_v16 }
 0x197   :  { %v518_v17 = vrot.slane %v490_v5, %v371_v9  ;;  %v380_v24 = vrot.slane %v353_v6, %v371_v9 }
 0x199   :  { %v537_v27 = vsel %vm405_vm0, %v518_v17, %v536_v23  ;;  %v404_v38 = vsel %vm403_vm15, %v380_v24, %v402_v33  ;;  %v1881_v33 = vld [vmem:[#allocation9 + $0x48] sm:$0xff]  }
 0x19a   :  { %v493_v7 = vpop.permute.xlu0 %492  ;;  %v356_v8 = vpop.permute.xlu1 %355 }
 0x19b   :  { %v522_v18 = vrot.slane %v493_v7, %v371_v9  ;;  %v384_v28 = vrot.slane %v356_v8, %v371_v9 }
 0x19d   :  { %v538_v29 = vsel %vm407_vm2, %v522_v18, %v537_v27  ;;  %v406_v42 = vsel %vm405_vm0, %v384_v28, %v404_v38  ;;  %v1885_v38 = vld [vmem:[#allocation9 + $0x68] sm:$0xff]  }
 0x19e   :  { %v496_v12 = vpop.permute.xlu0 %495  ;;  %v359_v13 = vpop.permute.xlu1 %358 }
 0x19f   :  { %v526_v22 = vrot.slane %v496_v12, %v371_v9  ;;  %v388_v30 = vrot.slane %v359_v13, %v371_v9 }
 0x1a1   :  { %v539_v35 = vsel %vm409_vm3, %v526_v22, %v538_v29  ;;  %v408_v44 = vsel %vm407_vm2, %v388_v30, %v406_v42  ;;  %v2451_v42 = vld [vmem:[#allocation11] sm:$0x3] }
 0x1a2   :  { %v499_v19 = vpop.permute.xlu0 %498  ;;  %v362_v20 = vpop.permute.xlu1 %361 }
 0x1a3   :  { %v530_v25 = vrot.slane %v499_v19, %v371_v9  ;;  %v392_v36 = vrot.slane %v362_v20, %v371_v9 }
 0x1a5   :  { %v540_v40 = vsel %vm411_vm4, %v530_v25, %v539_v35  ;;  %v410_v47 = vsel %vm409_vm3, %v392_v36, %v408_v44  ;;  %v1882_v35 = vld [vmem:[#allocation9 + $0x50] sm:$0xff]   ;;  %v1883_v36 = vld [vmem:[#allocation9 + $0x58] sm:$0xff]  }
 0x1a6   :  { %v502_v31 = vpop.permute.xlu0 %501  ;;  %v365_v32 = vpop.permute.xlu1 %364 }
 0x1a7   :  { %v534_v37 = vrot.slane %v502_v31, %v371_v9  ;;  %v396_v41 = vrot.slane %v365_v32, %v371_v9  ;;  %v1880_v32 = vld [vmem:[#allocation9 + $0x40] sm:$0xff]  }
 0x1a9   :  { %v541_v43 = vsel %vm413_vm5, %v534_v37, %v540_v40  ;;  %v412_v49 = vsel %vm411_vm4, %v396_v41, %v410_v47  ;;  %v1884_v37 = vld [vmem:[#allocation9 + $0x60] sm:$0xff]   ;;  %v1886_v40 = vld [vmem:[#allocation9 + $0x70] sm:$0xff]   ;;  %v1887_v41 = vld [vmem:[#allocation9 + $0x78] sm:$0xff]  }
 0x1aa   :  { %v542_v45 = vpack.c.b16 %v541_v43, %v541_v43  ;;  %v368_v46 = vpop.permute.xlu1 %367 }
 0x1ab   :  { %v400_v48 = vrot.slane %v368_v46, %v371_v9  ;;  %v715_v46 = vrot.slane %v2451_v42, %v2255_v10 }
 0x1ac   :  { %1724 = vmatmul.mubr.msk.bf16.vlgmr.msra.gmra.mrb[0].mxu1 %vm162_vm1, %v542_v45 }
 0x1ad   :  { %v414_v51 = vsel %vm413_vm5, %v400_v48, %v412_v49  ;;  %1749 = vmatprep.mubr.msk.bf16.mxu1 %vm2098_vm11, %v2097_v34 }
 0x1ae   :  { %v415_v50 = vpack.c.b16 %v414_v51, %v414_v51 }
 0x1b0   :  { %1718 = vmatmul.mubr.msk.bf16.vlgmr.msra.gmra.mrb[0].mxu0 %vm162_vm1, %v415_v50 }
 0x1b1   :  { %1728 = vmatpush3.bf16.msra.mxu0 %v1872_v53  ;;  %1743 = vmatprep.mubr.msk.bf16.mxu0 %vm2098_vm11, %v2097_v34 }
 0x1b2   :  { %1729 = vmatprep.subr.bf16.mxu0 %v2097_v34 }
 0x1b5   :  { %1730 = vmatpush3.bf16.msra.mxu0 %v1873_v54 }
 0x1b6   :  { %1731 = vmatprep.subr.bf16.mxu0 %v2097_v34 }
 0x1b9   :  { %1732 = vmatpush3.bf16.msra.mxu0 %v1874_v55 }
 0x1ba   :  { %1733 = vmatprep.subr.bf16.mxu0 %v2097_v34 }
 0x1bd   :  { %1734 = vmatpush3.bf16.msra.mxu0 %v1875_v56 }
 0x1be   :  { %1735 = vmatprep.subr.bf16.mxu0 %v2097_v34 }
 0x1c1   :  { %1736 = vmatpush3.bf16.msra.mxu0 %v1876_v52 }
 0x1c2   :  { %1737 = vmatprep.subr.bf16.mxu0 %v2097_v34 }
 0x1c5   :  { %1738 = vmatpush3.bf16.msra.mxu0 %v1877_v58  ;;  %v1018_v58 = vld [vmem:[%s2625_s5] sm:$0x3] }
 0x1c6   :  { %1739 = vmatprep.subr.bf16.mxu0 %v2097_v34 }
 0x1c9   :  { %1740 = vmatpush3.bf16.msra.mxu0 %v1878_v60  ;;  %v1053_v60 = vld [vmem:[#allocation8] sm:$0x3] }
 0x1ca   :  { %1741 = vmatprep.subr.bf16.mxu0 %v2097_v34  ;;  %v1064_v0 = vrot.slane %v1053_v60, %v2267_v39 }
 0x1cd   :  { %1742 = vmatpush3.bf16.msra.mxu0 %v1879_v61  ;;  %v1029_v61 = vrot.slane %v1018_v58, %v2267_v39 }
 0x1ce   :  { %1791 = vmatprep.subr.bf16.mxu0 %v2097_v34 }
 0x1cf   :  { %1031 = vbcast.lane.b32.xlu1 %v1029_v61, 256 }
 0x21d   :  { %v591_v14 = vpop.xlane.xlu1 %590 }
 0x21e   :  { %v595_v15 = vadd.f32 1.0, %v591_v14  ;;  %v1891_v14 = vld [vmem:[%s2629_s9 + $0x8] sm:$0xff]  }
 0x220   :  { %1912 = vrcp.f32 %v595_v15  ;;  %v1892_v15 = vld [vmem:[#allocation12 + $0x10] sm:$0xff]  }
 0x221   :  { %v594_v16 = vpop.xlane.xlu0 %593 }
 0x222   :  { %v596_v17 = vadd.f32 1.0, %v594_v16  ;;  %v1893_v16 = vld [vmem:[%s2629_s9 + $0x10] sm:$0xff]  }
 0x224   :  { %1914 = vrcp.f32 %v596_v17  ;;  %v1894_v17 = vld [vmem:[#allocation12 + $0x18] sm:$0xff]  }
 0x22a   :  { %v1913_v18 = vpop.eup %1912 }
 0x22b   :  { %v599_v19 = vmul.f32 %v1913_v18, %v122_v62  ;;  %v1022_v62 = vrot.slane %v1018_v58, %v2255_v10  ;;  %v1895_v18 = vld [vmem:[%s2629_s9 + $0x18] sm:$0xff]  }
 0x22d   :  { %v2428_v27 = vpack.c.bf16 %v599_v19, %v599_v19  ;;  %1024 = vbcast.lane.b32.xlu0 %v1022_v62, 256  ;;  %v1896_v19 = vld [vmem:[#allocation12 + $0x20] sm:$0xff]  }
 0x22e   :  { %v1915_v28 = vpop.eup %1914 }
 0x22f   :  { %v600_v29 = vmul.f32 %v1915_v28, %v123_v63  ;;  %v1057_v63 = vrot.slane %v1053_v60, %v2255_v10  ;;  %v1888_v10 = vld [vmem:[#allocation12] sm:$0xff]   ;;  %v922_v28 = vrot.slane %v2451_v42, %v2267_v39 }
 0x231   :  { %v2437_v31 = vpack.c.bf16 %v600_v29, %v600_v29  ;;  %1059 = vbcast.lane.b32.xlu1 %v1057_v63, 256  ;;  %1066 = vbcast.lane.b32.xlu0 %v1064_v0, 256  ;;  %v1014_v29 = vstv %s1013_s17  ;;  %v2099_v0 = vmov 1983009808  }
 0x27f   :  { %v583_v2 = vpop.f32.mrb[0].mxu1 }
 0x280   :  { %v1725_v5 = vpop.f32.mrb[1].mxu1 }
 0x281   :  { %v586_v6 = vpop.f32.mrb[2].mxu1 }
 0x282   :  { %v1726_v7 = vpop.f32.mrb[3].mxu1 }
 0x283   :  { %v457_v8 = vpop.f32.mrb[0].mxu0 }
 0x284   :  { %v604_v9 = vpack.c.bf16 %v583_v2, %v457_v8  ;;  %v1719_v11 = vpop.f32.mrb[1].mxu0 }
 0x285   :  { %v460_v12 = vpop.f32.mrb[2].mxu0 }
 0x286   :  { %v1720_v13 = vpop.f32.mrb[3].mxu0  ;;  %1744 = vmatmul.mubr.bf16.vlgmr.msra.gmra.mrb[4].mxu0 %v604_v9  ;;  %v1889_v12 = vld [vmem:[%s2629_s9] sm:$0xff]  }
 0x287   :  { %1807 = vmatprep.mubr.msk.bf16.mxu0 %vm2098_vm11, %v2097_v34  ;;  %1792 = vmatpush3.bf16.msra.mxu0 %v1888_v10  ;;  %v1890_v13 = vld [vmem:[#allocation12 + $0x8] sm:$0xff]  }
 0x288   :  { %1793 = vmatprep.subr.bf16.mxu0 %v2097_v34 }
 0x28b   :  { %1794 = vmatpush3.bf16.msra.mxu0 %v1890_v13 }
 0x28c   :  { %1795 = vmatprep.subr.bf16.mxu0 %v2097_v34 }
 0x28f   :  { %1796 = vmatpush3.bf16.msra.mxu0 %v1892_v15 }
 0x290   :  { %1797 = vmatprep.subr.bf16.mxu0 %v2097_v34 }
 0x293   :  { %1798 = vmatpush3.bf16.msra.mxu0 %v1894_v17 }
 0x294   :  { %1799 = vmatprep.subr.bf16.mxu0 %v2097_v34 }
 0x297   :  { %1800 = vmatpush3.bf16.msra.mxu0 %v1896_v19 }
 0x298   :  { %1801 = vmatprep.subr.bf16.mxu0 %v2097_v34 }
 0x359   :  { %v703_v20 = vpop.f32.mrb[4].mxu0 }
 0x35a   :  { %v710_v21 = vpack.c.bf16 %v703_v20, %v703_v20  ;;  %v1745_v22 = vpop.f32.mrb[5].mxu0  ;;  %v1897_v20 = vld [vmem:[%s2629_s9 + $0x20] sm:$0xff]  }
 0x35b   :  { %v706_v23 = vpop.f32.mrb[6].mxu0  ;;  %v1899_v22 = vld [vmem:[%s2629_s9 + $0x28] sm:$0xff]  }
 0x35c   :  { %v720_v24 = vsel %vm419_vm6, %v710_v21, 0  ;;  %v711_v25 = vpack.c.bf16 %v706_v23, %v706_v23  ;;  %v1746_v26 = vpop.f32.mrb[7].mxu0  ;;  %v1898_v21 = vld [vmem:[#allocation12 + $0x28] sm:$0xff]   ;;  %v1900_v23 = vld [vmem:[#allocation12 + $0x30] sm:$0xff]  }
 0x35d   :  { %1748 = vmatpush3.bf16.msra.mxu1 %v720_v24  ;;  %1802 = vmatpush3.bf16.msra.mxu0 %v1898_v21  ;;  %v1901_v24 = vld [vmem:[%s2629_s9 + $0x30] sm:$0xff]   ;;  %v1903_v26 = vld [vmem:[%s2629_s9 + $0x38] sm:$0xff]  }
 0x35e   :  { %1753 = vmatprep.subr.bf16.mxu1 %v2097_v34  ;;  %v766_v30 = vsel %vm419_vm6, %v711_v25, 0  ;;  %1803 = vmatprep.subr.bf16.mxu0 %v2097_v34  ;;  %v1902_v25 = vld [vmem:[#allocation12 + $0x38] sm:$0xff]  }
 0x360   :  { %1750 = vmatmul.mubr.msk.bf16.vlgmr.msra.gmra.mrb[4].mxu1 %vm162_vm1, %v2428_v27 }
 0x361   :  { %1754 = vmatpush3.bf16.msra.mxu1 %v766_v30  ;;  %1755 = vmatprep.mubr.msk.bf16.mxu1 %vm2098_vm11, %v2097_v34  ;;  %v1025_v30 = vpop.permute.xlu0 %1024 }
 0x362   :  { %1759 = vmatprep.subr.bf16.mxu1 %v2097_v34  ;;  %1804 = vmatpush3.bf16.msra.mxu0 %v1900_v23  ;;  %vm1033_vm7 = vcmp.gt.f32.partialorder %v1025_v30, 0.0 }
 0x363   :  { %1805 = vmatprep.subr.bf16.mxu0 %v2097_v34 }
 0x366   :  { %1806 = vmatpush3.bf16.msra.mxu0 %v1902_v25 }
 0x367   :  { %1831 = vmatprep.subr.bf16.mxu0 %v2097_v34 }
 0x368   :  { %1756 = vmatmul.mubr.msk.bf16.vlgmr.msra.gmra.mrb[8].mxu1 %vm162_vm1, %v2437_v31 }
 0x369   :  { %1760 = vmatpush3.bf16.msra.mxu1 %v1880_v32  ;;  %1775 = vmatprep.mubr.msk.bf16.mxu1 %vm2098_vm11, %v2097_v34 }
 0x36a   :  { %1761 = vmatprep.subr.bf16.mxu1 %v2097_v34 }
 0x36d   :  { %1762 = vmatpush3.bf16.msra.mxu1 %v1881_v33 }
 0x36e   :  { %1763 = vmatprep.subr.bf16.mxu1 %v2097_v34 }
 0x371   :  { %1764 = vmatpush3.bf16.msra.mxu1 %v1882_v35 }
 0x372   :  { %1765 = vmatprep.subr.bf16.mxu1 %v2097_v34 }
 0x375   :  { %1766 = vmatpush3.bf16.msra.mxu1 %v1883_v36 }
 0x376   :  { %1767 = vmatprep.subr.bf16.mxu1 %v2097_v34 }
 0x379   :  { %1768 = vmatpush3.bf16.msra.mxu1 %v1884_v37 }
 0x37a   :  { %1769 = vmatprep.subr.bf16.mxu1 %v2097_v34 }
 0x37d   :  { %1770 = vmatpush3.bf16.msra.mxu1 %v1885_v38 }
 0x37e   :  { %1771 = vmatprep.subr.bf16.mxu1 %v2097_v34 }
 0x381   :  { %1772 = vmatpush3.bf16.msra.mxu1 %v1886_v40 }
 0x382   :  { %1773 = vmatprep.subr.bf16.mxu1 %v2097_v34 }
 0x385   :  { %1774 = vmatpush3.bf16.msra.mxu1 %v1887_v41 }
 0x386   :  { %1779 = vmatprep.subr.bf16.mxu1 %v2097_v34 }
 0x433   :  { %v756_v43 = vpop.f32.mrb[4].mxu1 }
 0x434   :  { %v1751_v44 = vpop.f32.mrb[5].mxu1  ;;  %v757_v48 = vadd.f32 %v756_v43, %v715_v46 }
 0x435   :  { %v759_v45 = vpop.f32.mrb[6].mxu1 }
 0x436   :  { %v1752_v47 = vpop.f32.mrb[7].mxu1  ;;  %v808_v54 = vmax.f32 %v757_v48, 0.0 }
 0x43b   :  { %v802_v49 = vpop.f32.mrb[8].mxu1 }
 0x43c   :  { %v803_v51 = vadd.f32 %v802_v49, %v715_v46  ;;  %v1757_v53 = vpop.f32.mrb[9].mxu1  ;;  %v1067_v46 = vpop.permute.xlu0 %1066 }
 0x43d   :  { %v805_v50 = vpop.f32.mrb[10].mxu1  ;;  %vm1069_vm9 = vcmp.gt.f32.partialorder %v1067_v46, 0.0  ;;  %v1905_v46 = vld [vmem:[%s2632_s12 + $0x8] sm:$0xff]  }
 0x43e   :  { %v809_v55 = vmax.f32 %v803_v51, 0.0  ;;  %v1758_v56 = vpop.f32.mrb[11].mxu1 }
 0x440   :  { %v810_v52 = vpack.c.bf16 %v809_v55, %v808_v54 }
 0x442   :  { %1776 = vmatmul.mubr.bf16.vlgmr.msra.gmra.mrb[12].mxu1 %v810_v52 }
 0x443   :  { %1781 = vmatprep.mubr.msk.bf16.mxu1 %vm2098_vm11, %v2097_v34 }
 0x515   :  { %v910_v1 = vpop.f32.mrb[12].mxu1 }
 0x516   :  { %v917_v2 = vpack.c.bf16 %v910_v1, %v910_v1  ;;  %v1777_v5 = vpop.f32.mrb[13].mxu1  ;;  %v1091_v1 = vunpack.c.l.s4 %v2099_v0 }
 0x517   :  { %v913_v6 = vpop.f32.mrb[14].mxu1 }
 0x518   :  { %v924_v7 = vsel %vm419_vm6, %v917_v2, 0  ;;  %v918_v8 = vpack.c.bf16 %v913_v6, %v913_v6  ;;  %v1778_v9 = vpop.f32.mrb[15].mxu1 }
 0x519   :  { %1780 = vmatpush3.bf16.msra.mxu1 %v924_v7 }
 0x51a   :  { %1785 = vmatprep.subr.bf16.mxu1 %v2097_v34  ;;  %v967_v11 = vsel %vm419_vm6, %v918_v8, 0 }
 0x51c   :  { %1782 = vmatmul.mubr.msk.bf16.vlgmr.msra.gmra.mrb[16].mxu1 %vm162_vm1, %v2428_v27  ;;  %v1032_v27 = vpop.permute.xlu1 %1031 }
 0x51d   :  { %1786 = vmatpush3.bf16.msra.mxu1 %v967_v11  ;;  %1787 = vmatprep.mubr.msk.bf16.mxu1 %vm2098_vm11, %v2097_v34  ;;  %vm1034_vm10 = vcmp.gt.f32.partialorder %v1032_v27, 0.0  ;;  %v1092_v11 = vunpack.c.0.s8 %v1091_v1 }
 0x51e   :  { %1811 = vmatprep.subr.bf16.mxu1 %v2097_v34 }
 0x520   :  { %v1060_v32 = vpop.permute.xlu1 %1059 }
 0x521   :  { %vm1068_vm8 = vcmp.gt.f32.partialorder %v1060_v32, 0.0 }
 0x524   :  { %1788 = vmatmul.mubr.msk.bf16.vlgmr.msra.gmra.mrb[20].mxu1 %vm162_vm1, %v2437_v31  ;;  %vm2520_vm1 = vcmp.eq.s32.totalorder %v1014_v29, 1 }
 0x525   :  { %1827 = vmatprep.mubr.msk.bf16.mxu1 %vm2098_vm11, %v2097_v34  ;;  %1812 = vmatpush3.bf16.msra.mxu1 %v1889_v12 }
 0x526   :  { %1813 = vmatprep.subr.bf16.mxu1 %v2097_v34 }
 0x529   :  { %1814 = vmatpush3.bf16.msra.mxu1 %v1891_v14 }
 0x52a   :  { %1815 = vmatprep.subr.bf16.mxu1 %v2097_v34 }
 0x52d   :  { %1816 = vmatpush3.bf16.msra.mxu1 %v1893_v16 }
 0x52e   :  { %1817 = vmatprep.subr.bf16.mxu1 %v2097_v34 }
 0x531   :  { %1818 = vmatpush3.bf16.msra.mxu1 %v1895_v18 }
 0x532   :  { %1819 = vmatprep.subr.bf16.mxu1 %v2097_v34 }
 0x535   :  { %1820 = vmatpush3.bf16.msra.mxu1 %v1897_v20 }
 0x536   :  { %1821 = vmatprep.subr.bf16.mxu1 %v2097_v34 }
 0x539   :  { %1822 = vmatpush3.bf16.msra.mxu1 %v1899_v22 }
 0x53a   :  { %1823 = vmatprep.subr.bf16.mxu1 %v2097_v34 }
 0x53d   :  { %1824 = vmatpush3.bf16.msra.mxu1 %v1901_v24 }
 0x53e   :  { %1825 = vmatprep.subr.bf16.mxu1 %v2097_v34 }
 0x541   :  { %1826 = vmatpush3.bf16.msra.mxu1 %v1903_v26 }
 0x5ef   :  { %v960_v31 = vpop.f32.mrb[16].mxu1 }
 0x5f0   :  { %v961_v33 = vadd.f32 %v960_v31, %v922_v28  ;;  %v1783_v35 = vpop.f32.mrb[17].mxu1 }
 0x5f1   :  { %v963_v36 = vpop.f32.mrb[18].mxu1  ;;  %v1904_v35 = vld [vmem:[%s2632_s12] sm:$0xff]  }
 0x5f2   :  { %v1009_v38 = vmax.f32 %v961_v33, 0.0  ;;  %v1784_v40 = vpop.f32.mrb[19].mxu1 }
 0x5f4   :  { %v1016_v41 = vsel %vm2520_vm1, %v1009_v38, %v2376_v59 }
 0x5f5   :  { %v1039_v39 = vsel %vm1033_vm7, %v1016_v41, -1000.0  ;;  %v1074_v42 = vsel %vm1068_vm8, %v1016_v41, -1000.0 }
 0x5f6   :  { %v1041_v43 = vrot.slane %v1039_v39, 4  ;;  %v1076_v44 = vrot.slane %v1074_v42, 4 }
 0x5f7   :  { %v1003_v45 = vpop.f32.mrb[20].mxu1 }
 0x5f8   :  { %v1042_v47 = vmax.f32 %v1039_v39, %v1041_v43  ;;  %v1077_v48 = vmax.f32 %v1074_v42, %v1076_v44  ;;  %v1004_v49 = vadd.f32 %v1003_v45, %v922_v28  ;;  %v1789_v51 = vpop.f32.mrb[21].mxu1 }
 0x5f9   :  { %v1006_v53 = vpop.f32.mrb[22].mxu1  ;;  %v1909_v51 = vld [vmem:[%s2632_s12 + $0x28] sm:$0xff]  }
 0x5fa   :  { %v1043_v50 = vrot.slane %v1042_v47, 2  ;;  %v1078_v54 = vrot.slane %v1077_v48, 2  ;;  %v1010_v55 = vmax.f32 %v1004_v49, 0.0  ;;  %v1790_v56 = vpop.f32.mrb[23].mxu1  ;;  %v1908_v49 = vld [vmem:[%s2632_s12 + $0x20] sm:$0xff]   ;;  %v1910_v53 = vld [vmem:[%s2632_s12 + $0x30] sm:$0xff]  }
 0x5fb   :  { %v1645_v56 = vld [vmem:[%s2631_s11] ss:$0 sm:$0xff]  ;;  %s1500_s11 = sld [smem:[#allocation3]] }
 0x5fc   :  { %v1044_v52 = vmax.f32 %v1042_v47, %v1043_v50  ;;  %v1079_v58 = vmax.f32 %v1077_v48, %v1078_v54  ;;  %v1017_v59 = vsel %vm2520_vm1, %v1010_v55, %v2368_v57  ;;  %v1095_v57 = vsub.s32 %v1092_v11, %v2248_v3  ;;  %v1906_v47 = vld [vmem:[%s2632_s12 + $0x10] sm:$0xff]   ;;  %v1907_v48 = vld [vmem:[%s2632_s12 + $0x18] sm:$0xff]  }
 0x5fd   :  { %v1040_v60 = vsel %vm1034_vm10, %v1017_v59, -1000.0  ;;  %v1075_v61 = vsel %vm1069_vm9, %v1017_v59, -1000.0  ;;  %v1911_v50 = vld [vmem:[%s2632_s12 + $0x38] sm:$0xff]  }
 0x5fe   :  { %v1047_v62 = vrot.slane %v1040_v60, 4  ;;  %v1082_v63 = vrot.slane %v1075_v61, 4  ;;  %v1045_v2 = vrot.slane %v1044_v52, 1  ;;  %v1080_v5 = vrot.slane %v1079_v58, 1 }
 0x600   :  { %v1048_v6 = vmax.f32 %v1040_v60, %v1047_v62  ;;  %v1083_v7 = vmax.f32 %v1075_v61, %v1082_v63  ;;  %v1046_v10 = vmax.f32 %v1044_v52, %v1045_v2  ;;  %v1081_v12 = vmax.f32 %v1079_v58, %v1080_v5  ;;  %v1646_v5 = vld [vmem:[%s2633_s13] ss:$0 sm:$0xff]  ;;  %s1656_s13 = sld [smem:[#allocation3 + $0x1]] }
 0x602   :  { %v1049_v8 = vrot.slane %v1048_v6, 2  ;;  %v1084_v9 = vrot.slane %v1083_v7, 2  ;;  %v1138_v17 = vpack.c.bf16 %v1046_v10, %v1046_v10  ;;  %v1156_v18 = vpack.c.bf16 %v1081_v12, %v1081_v12 }
 0x603   :  { %v1096_v25 = vrot.slane %v1046_v10, %v1095_v57  ;;  %v1121_v27 = vrot.slane %v1081_v12, %v1095_v57 }
 0x604   :  { %v1050_v13 = vmax.f32 %v1048_v6, %v1049_v8  ;;  %v1085_v14 = vmax.f32 %v1083_v7, %v1084_v9  ;;  %v1271_v26 = vunpack.c.l.b16 %v1138_v17  ;;  %v1176_v28 = vunpack.c.l.b16 %v1156_v18 }
 0x605   :  { %v1501_v17 = vstv %s1500_s11 }
 0x606   :  { %v1051_v15 = vrot.slane %v1050_v13, 1  ;;  %v1086_v16 = vrot.slane %v1085_v14, 1  ;;  %v1519_v18 = vstv %s1656_s13  ;;  %vm1502_vm13 = vcmp.eq.s32.totalorder %v2250_v4, %v1501_v17 }
 0x607   :  { %vm1520_vm6 = vcmp.eq.s32.totalorder %v2250_v4, %v1519_v18 }
 0x608   :  { %v1052_v19 = vmax.f32 %v1050_v13, %v1051_v15  ;;  %v1087_v20 = vmax.f32 %v1085_v14, %v1086_v16 }
 0x60a   :  { %v1128_v21 = vrot.slane %v1087_v20, %v1095_v57  ;;  %v1139_v22 = vpack.c.bf16 %v1052_v19, %v1052_v19  ;;  %v1157_v23 = vpack.c.bf16 %v1087_v20, %v1087_v20  ;;  %v1103_v24 = vrot.slane %v1052_v19, %v1095_v57 }
 0x60c   :  { %v1131_v29 = vrot.slane %v1128_v21, 7  ;;  %v1177_v30 = vunpack.c.l.b16 %v1157_v23  ;;  %v1272_v31 = vunpack.c.l.b16 %v1139_v22  ;;  %v1106_v32 = vrot.slane %v1103_v24, 7 }
 0x60d   :  { %v1655_v22 = vsel %vm1502_vm13, 1.0, %v2097_v34  ;;  %v1657_v23 = vsel %vm1520_vm6, 1.0, %v2097_v34 }
 0x60e   :  { %v1178_v33 = vsel %vm401_vm14, %v1177_v30, %v1176_v28  ;;  %v1273_v3 = vsel %vm401_vm14, %v1272_v31, %v1271_v26  ;;  %v1107_v36 = vsel %vm401_vm14, %v1106_v32, %v1096_v25  ;;  %v1132_v37 = vsel %vm401_vm14, %v1131_v29, %v1121_v27 }
 0x60f   :  { %v1179_v38 = vpack.c.b16 %v1178_v33, %v1178_v33  ;;  %v1274_v40 = vpack.c.b16 %v1273_v3, %v1273_v3  ;;  %v1108_v41 = vsel %vm405_vm0, %v1106_v32, %v1107_v36  ;;  %v1133_v39 = vsel %vm405_vm0, %v1131_v29, %v1132_v37 }
 0x610   :  { %v1109_v42 = vsel %vm409_vm3, %v1106_v32, %v1108_v41  ;;  %v1134_v43 = vsel %vm409_vm3, %v1131_v29, %v1133_v39 }
 0x611   :  { %1808 = vmatmul.mubr.bf16.vlgmr.msra.gmra.mrb[8].mxu0 %v1179_v38  ;;  %1828 = vmatmul.mubr.bf16.vlgmr.msra.gmra.mrb[24].mxu1 %v1274_v40  ;;  %v1110_v44 = vsel %vm413_vm5, %v1106_v32, %v1109_v42  ;;  %v1135_v45 = vsel %vm413_vm5, %v1131_v29, %v1134_v43 }
 0x612   :  { %1832 = vmatpush3.bf16.msra.mxu0 %v1904_v35  ;;  %1847 = vmatprep.mubr.msk.bf16.mxu0 %vm2098_vm11, %v2097_v34  ;;  %1112 = vst [vmem:[#allocation14] sm:$0x3] %v1110_v44  ;;  %1137 = vst [vmem:[#allocation14 + $0x2] sm:$0x3] %v1135_v45  ;;  %vm1506_vm11 = vcmask 57344  }
 0x613   :  { %1833 = vmatprep.subr.bf16.mxu0 %v2097_v34 }
 0x616   :  { %1834 = vmatpush3.bf16.msra.mxu0 %v1905_v46 }
 0x617   :  { %1835 = vmatprep.subr.bf16.mxu0 %v2097_v34 }
 0x61a   :  { %1836 = vmatpush3.bf16.msra.mxu0 %v1906_v47 }
 0x61b   :  { %1837 = vmatprep.subr.bf16.mxu0 %v2097_v34 }
 0x61e   :  { %1838 = vmatpush3.bf16.msra.mxu0 %v1907_v48 }
 0x61f   :  { %1839 = vmatprep.subr.bf16.mxu0 %v2097_v34 }
 0x622   :  { %1840 = vmatpush3.bf16.msra.mxu0 %v1908_v49 }
 0x623   :  { %1841 = vmatprep.subr.bf16.mxu0 %v2097_v34 }
 0x626   :  { %1842 = vmatpush3.bf16.msra.mxu0 %v1909_v51 }
 0x627   :  { %1843 = vmatprep.subr.bf16.mxu0 %v2097_v34 }
 0x62a   :  { %1844 = vmatpush3.bf16.msra.mxu0 %v1910_v53 }
 0x62b   :  { %1845 = vmatprep.subr.bf16.mxu0 %v2097_v34 }
 0x62e   :  { %1846 = vmatpush3.bf16.msra.mxu0 %v1911_v50 }
 0x6e4   :  { %v1263_v54 = vpop.f32.mrb[8].mxu0  ;;  %v1358_v55 = vpop.f32.mrb[24].mxu1 }
 0x6e5   :  { %v1359_v52 = vadd.f32 %v1358_v55, %v1263_v54  ;;  %v1809_v58 = vpop.f32.mrb[9].mxu0  ;;  %v1829_v59 = vpop.f32.mrb[25].mxu1 }
 0x6e6   :  { %v1266_v60 = vpop.f32.mrb[10].mxu0  ;;  %v1361_v61 = vpop.f32.mrb[26].mxu1 }
 0x6e7   :  { %v1371_v62 = vadd.f32 %v1645_v56, %v1359_v52  ;;  %v1810_v63 = vpop.f32.mrb[11].mxu0  ;;  %v1830_v0 = vpop.f32.mrb[27].mxu1 }
 0x6e9   :  { %v1372_v1 = vmax.f32 %v1371_v62, 0.0 }
 0x6eb   :  { %v1373_v2 = vpack.c.bf16 %v1372_v1, %v1372_v1 }
 0x6ed   :  { %1848 = vmatmul.mubr.bf16.vlgmr.msra.gmra.mrb[12].mxu0 %v1373_v2 }
 0x7c0   :  { %v1479_v6 = vpop.f32.mrb[12].mxu0 }
 0x7c1   :  { %v1480_v7 = vadd.f32 %v1646_v5, %v1479_v6  ;;  %v1849_v8 = vpop.f32.mrb[13].mxu0 }
 0x7c2   :  { %v1482_v9 = vpop.f32.mrb[14].mxu0 }
 0x7c3   :  { %v1850_v11 = vpop.f32.mrb[15].mxu0  ;;  %v1487_v10 = vsel %vm1485_vm12, %v1480_v7, -inf  ;;  %1486 = vst.msk [vmem:[#allocation15] sm:$0x3] %vm1485_vm12, %v1480_v7 }
 0x7c4   :  { %1488 = vmax.xlane.f32.xlu1 %v1487_v10 }
 0x851   :  { %v1489_v12 = vpop.xlane.xlu1 %1488 }
 0x852   :  { %v1490_v13 = vsub.f32 %v1480_v7, %v1489_v12 }
 0x854   :  { %v1491_v14 = vmul.f32 1.442695, %v1490_v13 }
 0x856   :  { %1916 = vpow2.f32 %v1491_v14 }
 0x860   :  { %v1917_v15 = vpop.eup %1916 }
 0x861   :  { %v1493_v16 = vsel %vm1485_vm12, %v1917_v15, 0.0 }
 0x862   :  { %1494 = vadd.xlane.f32.xlu0 %v1493_v16 }
 0x8ef   :  { %v1495_v57 = vpop.xlane.xlu0 %1494 }
 0x8f0   :  { %1918 = vlog2.f32 %v1495_v57 }
 0x8fa   :  { %v1919_v19 = vpop.eup %1918 }
 0x8fb   :  { %v1497_v20 = vmul.f32 0.6931472, %v1919_v19 }
 0x8fd   :  { %v1498_v21 = vadd.f32 %v1497_v20, %v1489_v12 }
 0x8ff   :  { %v1499_v24 = vsub.f32 %v1480_v7, %v1498_v21 }
 0x901   :  { %v1505_v25 = vmul.f32 %v1655_v22, %v1499_v24  ;;  %v1523_v26 = vmul.f32 %v1657_v23, %v1499_v24 }
 0x903   :  { %v1507_v27 = vsel %vm1506_vm11, %v1505_v25, 0.0  ;;  %v1525_v28 = vrot.slane %v1523_v26, 1 }
 0x904   :  { %1508 = vadd.xlane.f32.xlu0 %v1507_v27 }
 0x905   :  { %v1527_v29 = vsel %vm1506_vm11, %v1525_v28, 0.0 }
 0x908   :  { %1528 = vadd.xlane.f32.xlu0 %v1527_v29 }
 0x909   :  { %2031 = shalt.err (!%p2028_p0)
}
 0x90a   :  { %s2032_s6 = scalar_lea.hbm %s2634_s14, 64 }
 0x90b   :  { %p2033_p1 = scmp.ne.s32.totalorder %s2634_s14, %s2032_s6  ;;  %p2036_p2 = scmp.lt.u32.totalorder %s2032_s6, %s2634_s14 }
 0x90d   :  { %p2038_p3 = pnand %p2036_p2, %p2033_p1 }
 0x90f   :  { %2041 = shalt.err (!%p2038_p3)
}
 0x910   :  { %1552 = dma.vmem_to_hbm [thread:$0]  %s1550_s10, 64, %s2634_s14, [#allocation5]  }
 0x911   :  { %s2042_s21 = scalar_lea.vmem %s1560_s19, 32  ;;  %p2047_p5 = scmp.lt.s32.totalorder %s1560_s19, %s1560_s19 }
 0x912   :  { %p2043_p4 = scmp.ne.s32.totalorder %s1560_s19, %s2042_s21  ;;  %p2048_p6 = scmp.lt.s32.totalorder %s2042_s21, %s2042_s21 }
 0x914   :  { %p2049_p7 = por %p2048_p6, %p2047_p5 }
 0x916   :  { %p2050_p8 = pnand %p2049_p7, %p2043_p4 }
 0x918   :  { %2053 = shalt.err (!%p2050_p8)
}
 0x919   :  { %s2054_s26 = scalar_lea.hbm %s2635_s15, 32 }
 0x91a   :  { %p2055_p9 = scmp.ne.s32.totalorder %s2635_s15, %s2054_s26  ;;  %p2058_p10 = scmp.lt.u32.totalorder %s2054_s26, %s2635_s15 }
 0x91c   :  { %p2060_p11 = pnand %p2058_p10, %p2055_p9 }
 0x91e   :  { %2063 = shalt.err (!%p2060_p11)
}
 0x91f   :  { %1562 = dma.vmem_to_hbm [thread:$0]  %s1560_s19, 32, %s2635_s15, [#allocation16]  }
 0x920   :  { %s2064_s10 = scalar_lea.hbm %s2636_s16, 16 }
 0x921   :  { %p2065_p12 = scmp.ne.s32.totalorder %s2636_s16, %s2064_s10  ;;  %p2068_p13 = scmp.lt.u32.totalorder %s2064_s10, %s2636_s16 }
 0x923   :  { %p2070_p0 = pnand %p2068_p13, %p2065_p12 }
 0x991   :  { %v1509_v4 = vpop.xlane.xlu0 %1508 }
 0x992   :  { %v1510_v34 = vrot.slane %v1509_v4, 4 }
 0x994   :  { %v1511_v30 = vadd.f32 %v1510_v34, %v1509_v4 }
 0x995   :  { %v1529_v31 = vpop.xlane.xlu0 %1528 }
 0x996   :  { %v1512_v32 = vrot.slane %v1511_v30, 2  ;;  %v1530_v33 = vrot.slane %v1529_v31, 4 }
 0x998   :  { %v1531_v3 = vadd.f32 %v1530_v33, %v1529_v31  ;;  %v1513_v35 = vadd.f32 %v1512_v32, %v1511_v30 }
 0x99a   :  { %v1532_v36 = vrot.slane %v1531_v3, 2  ;;  %v1514_v37 = vrot.slane %v1513_v35, 1 }
 0x99c   :  { %v1533_v38 = vadd.f32 %v1532_v36, %v1531_v3  ;;  %v1515_v40 = vadd.f32 %v1514_v37, %v1513_v35 }
 0x99e   :  { %1851 = vpush %v1515_v40  ;;  %v1534_v41 = vrot.slane %v1533_v38, 1 }
 0x9a0   :  { %v1535_v39 = vadd.f32 %v1534_v41, %v1533_v38 }
 0x9a2   :  { %1853 = vpush %v1535_v39 }
 0x9cf   :  { %s1852_s7 = spop %1851 }
 0x9d0   :  { %s1517_s12 = ssub.f32 0.0, %s1852_s7 }
 0x9d3   :  { %s1854_s22 = spop %1853 }
 0x9d4   :  { %s1537_s15 = ssub.f32 %s1517_s12, %s1854_s22 }
 0x9d6   :  { %s1540_s11 = smul.f32 0.5, %s1537_s15 }
 0x9d8   :  { %1542 = sst [smem:[#allocation17]] %s1540_s11 }
 0x9d9   :  { %2073 = shalt.err (!%p2070_p0)
}
 0x9da   :  { %s2102_s9 = smov [#allocation17]  }
 0x9db   :  { %1570 = dma.smem_to_hbm %s2102_s9, 16, %s2636_s16, [#allocation6]  }
 0x9dc   :  { %2082 = dma.done.wait [#allocation5], 64  }
 0x9dd   :  { %2083 = vsyncadd [#allocation5], 4294967232 }
 0x9de   :  { %2084 = dma.done.wait [#allocation16], 32  }
 0x9df   :  { %2085 = vsyncadd [#allocation16], 4294967264 }
 0x9e0   :  { %2086 = dma.done.wait [#allocation6], 16  }
 0x9e1   :  { %2087 = vsyncadd [#allocation6], 4294967280 }
 0x9e2   :  { %1580 = sfence }
 0x9e3   :  { %1581 = vsyncpa [#allocation4], 1 }
 0x9e4   :  { %1582 = vsyncpa [#allocation10], 1 }
 0x9e5   :  { %1583 = vsyncpa [#allocation13], 1 }
 0x9e6   :  { %1584 = vsyncpa [#allocation5], 1 }
 0x9e7   :  { %1585 = vsyncpa [#allocation16], 1 }
 0x9e8   :  { %1586 = vsyncpa [#allocation6], 1 }
 0x9e9   :  { %1587 = vsyncpa [#allocation7], 1 }

</bundles_post_ra>
